<compile_context>
chip_gen: v7x
topology: tpu7x:2x2x1
jax: 0.10.0
libtpu: 0.0.40
codegen_flags: <defaults>
</compile_context>

<pallas_src>
import jax
import jax.numpy as jnp
from jax.experimental import pallas as pl
from jax.experimental.pallas import tpu as pltpu


def _spatial_descriptor_kernel(
    x_ref,                 # (1, 12, T) bf16 = [centers(3) ; corners(9)], channels-first
    w1t_ref, b1_ref,       # (256, 12) fused layer-1 weight^T (bf16), (256, 1) f32 bias
    w2t_ref, b2_ref,       # (256, 256) block-diagonal fused layer-2 weight^T, (256,1) bias
    wst_ref, bs_ref,       # (64, 128) spatial weight^T (hv half pre-scaled by 1/3), (64,1) bias
    out_ref,               # (1, 64, T)
):
    f32 = jnp.float32
    cdt = w1t_ref.dtype                           # MXU compute dtype (bf16)

    x = x_ref[0].astype(cdt)                      # (12, T); already bf16 -> no-op

    # Stage 1 (fused): centers-MLP L1 + vertices-MLP L1 on the three corner
    # pairs (0,1), (1,2), (2,0) -> four 64-row groups of h.
    h = jnp.dot(w1t_ref[...], x, preferred_element_type=f32)
    h = jnp.maximum(h + b1_ref[...], 0.0).astype(cdt)            # (256, T) bf16

    # Stage 2 (fused, block-diagonal): centers-MLP L2 + 3x vertices-MLP L2
    # in one (256,256)@(256,T) dot -> one MXU column-stream instead of four.
    h2 = jnp.dot(w2t_ref[...], h, preferred_element_type=f32)
    h2 = jnp.maximum(h2 + b2_ref[...], 0.0)                       # (256, T) f32

    hc = h2[0:64]                                                 # centers branch
    hv_sum = h2[64:128] + h2[128:192] + h2[192:256]               # f32; 1/3 folded into wst
    feat = jnp.concatenate([hc, hv_sum], axis=0).astype(cdt)      # (128, T) bf16

    # Stage 3 (fused): single K=128 dot replaces the two spatial half-dots.
    out = jnp.dot(wst_ref[...], feat, preferred_element_type=f32) + bs_ref[...]
    out_ref[0] = jnp.maximum(out, 0.0).astype(out_ref.dtype)


def init_params(key, eps=1e-5):
    """Deterministic conv + folded-BN (inference) params for all three MLPs."""
    def conv_bn(k, cin, cout):
        ks = jax.random.split(k, 6)
        w = jax.random.normal(ks[0], (cin, cout), jnp.float32) / jnp.sqrt(cin)
        b = 0.1 * jax.random.normal(ks[1], (cout,), jnp.float32)
        gamma = 1.0 + 0.1 * jax.random.normal(ks[2], (cout,), jnp.float32)
        beta = 0.1 * jax.random.normal(ks[3], (cout,), jnp.float32)
        mean = 0.1 * jax.random.normal(ks[4], (cout,), jnp.float32)
        var = jnp.abs(jax.random.normal(ks[5], (cout,), jnp.float32)) + 0.5
        s = gamma / jnp.sqrt(var + eps)              # fold BN into conv
        w_eff = w * s[None, :]
        b_eff = (b - mean) * s + beta
        return w_eff, b_eff

    keys = jax.random.split(key, 5)
    wc1, bc1 = conv_bn(keys[0], 3, 64)     # centers_mlp layer 1
    wc2, bc2 = conv_bn(keys[1], 64, 64)    # centers_mlp layer 2
    wv1, bv1 = conv_bn(keys[2], 6, 64)     # vertices_mlp layer 1
    wv2, bv2 = conv_bn(keys[3], 64, 64)    # vertices_mlp layer 2
    ws, bs = conv_bn(keys[4], 128, 64)     # spatial_mlp
    return (wc1, bc1, wc2, bc2, wv1, bv1, wv2, bv2, ws, bs)


def prepare_kernel_params(params, compute_dtype=jnp.bfloat16):
    """Host-side weight fusion:
      * layer-1 of centers-MLP + three corner-pair applications of the
        vertices-MLP layer-1 -> one (256, 12) weight,
      * all four layer-2 dots -> one block-diagonal (256, 256) weight,
      * the spatial (128->64) weight kept whole as (64, 128), hv half
        pre-scaled by 1/3 (folds the corner average into the matmul).
    MXU operands are cast to `compute_dtype`; biases stay f32."""
    wc1, bc1, wc2, bc2, wv1, bv1, wv2, bv2, ws, bs = params
    f32 = jnp.float32

    # ---- fused layer-1 weight, (cin=12, cout=256) form ----
    # Input channels: [0:3] centers xyz, [3:12] corners (3*i + d).
    # Output row groups: [0:64] centers L1, then vertices L1 on corner pairs
    # (0,1), (1,2), (2,0).
    w1_big = jnp.zeros((12, 256), f32)
    w1_big = w1_big.at[0:3, 0:64].set(wc1)            # centers
    w1_big = w1_big.at[3:9, 64:128].set(wv1)          # corners (0,1)
    w1_big = w1_big.at[6:12, 128:192].set(wv1)        # corners (1,2)
    w1_big = w1_big.at[9:12, 192:256].set(wv1[0:3])   # corners (2,0): corner 2
    w1_big = w1_big.at[3:6, 192:256].set(wv1[3:6])    # corners (2,0): corner 0
    b1_big = jnp.concatenate([bc1, bv1, bv1, bv1]).reshape(256, 1)

    # ---- fused block-diagonal layer-2 weight, already transposed (out,in) ----
    w2_block = jnp.zeros((256, 256), f32)
    w2_block = w2_block.at[0:64, 0:64].set(jnp.transpose(wc2))
    wv2t = jnp.transpose(wv2)
    w2_block = w2_block.at[64:128, 64:128].set(wv2t)
    w2_block = w2_block.at[128:192, 128:192].set(wv2t)
    w2_block = w2_block.at[192:256, 192:256].set(wv2t)
    b2_block = jnp.concatenate([bc2, bv2, bv2, bv2]).reshape(256, 1)

    # ---- spatial weight, transposed, hv half pre-scaled by 1/3 ----
    wst = jnp.transpose(ws)                            # (64, 128)
    wst = wst.at[:, 64:128].multiply(1.0 / 3.0)

    return (jnp.transpose(w1_big).astype(compute_dtype),   # (256, 12)
            b1_big.astype(f32),
            w2_block.astype(compute_dtype),                 # (256, 256)
            b2_block.astype(f32),
            wst.astype(compute_dtype),                      # (64, 128)
            bs.reshape(64, 1).astype(f32))


def spatial_descriptor_forward(centers, verts, faces, params, *, tile_n=2048,
                               compute_dtype=jnp.bfloat16, out_dtype=jnp.float32):
    """centers: (B, 3, N) f32 (PyTorch NCW); verts: (B, V, 3); faces: (B, N, 3) int32.
    Returns (B, 64, N) in `out_dtype`, matching the PyTorch module output layout."""
    B, c3, N = centers.shape
    assert c3 == 3

    kparams = prepare_kernel_params(params, compute_dtype)

    # --- glue: corner gather (torch.gather equivalent) + channels-first, in bf16
    # so both the XLA transpose/concat passes and the kernel input DMA are
    # half-width (the kernel would cast to bf16 anyway).
    centers_c = centers.astype(compute_dtype)
    verts_c = verts.astype(compute_dtype)
    gathered = verts_c[jnp.arange(B)[:, None, None], faces, :]      # (B, N, 3, 3)
    corners_cf = jnp.transpose(gathered, (0, 2, 3, 1)).reshape(B, 9, N)
    x12 = jnp.concatenate([centers_c, corners_cf], axis=1)          # (B, 12, N) bf16
    # TODO(synk): assembling the (12,T) block inside the kernel from two inputs
    # would drop this concat pass, but unaligned bf16 sublane concat is
    # relayout-heavy in Mosaic; the bf16 host concat is cheap fusable glue.

    # --- tile the face axis (lanes); pad instead of asserting divisibility ---
    tn = max(128, min(int(tile_n) // 128 * 128, pl.cdiv(N, 128) * 128))
    n_pad = pl.cdiv(N, tn) * tn
    if n_pad != N:
        x12 = jnp.pad(x12, ((0, 0), (0, 0), (0, n_pad - N)))

    grid = (B, n_pad // tn)

    out = pl.pallas_call(
        _spatial_descriptor_kernel,
        out_shape=jax.ShapeDtypeStruct((B, 64, n_pad), out_dtype),
        grid_spec=pltpu.PrefetchScalarGridSpec(
            num_scalar_prefetch=0,
            grid=grid,
            in_specs=[pl.BlockSpec((1, 12, tn), lambda b, n: (b, 0, n))]
                     + [pl.BlockSpec(p.shape, lambda b, n: (0, 0)) for p in kparams],
            out_specs=pl.BlockSpec((1, 64, tn), lambda b, n: (b, 0, n)),
        ),
        compiler_params=pltpu.CompilerParams(
            dimension_semantics=("parallel", "parallel"),
            # ~9 MiB live at T=2048; raise v5e's 16 MiB default scope, stay
            # well inside v7x's 64 MiB physical VMEM.
            vmem_limit_bytes=32 * 1024 * 1024,
        ),
    )(x12, *kparams)

    if n_pad != N:
        out = out[:, :, :N]
    return out


def reference_forward(centers, verts, faces, params):
    """Pure-JAX f32 reference mirroring the PyTorch forward (BN folded)."""
    wc1, bc1, wc2, bc2, wv1, bv1, wv2, bv2, ws, bs = params
    B, _, N = centers.shape
    corners = verts[jnp.arange(B)[:, None, None], faces, :].reshape(B, N, 9)
    c = jnp.transpose(centers, (0, 2, 1))

    def mlp2(x, w1, b1, w2, b2):
        h = jnp.maximum(x @ w1 + b1, 0.0)
        return jnp.maximum(h @ w2 + b2, 0.0)

    hc = mlp2(c, wc1, bc1, wc2, bc2)
    x1 = corners[..., 0:6]
    x2 = corners[..., 3:9]
    x3 = jnp.concatenate([corners[..., 6:9], corners[..., 0:3]], axis=-1)
    hv = (mlp2(x1, wv1, bv1, wv2, bv2)
          + mlp2(x2, wv1, bv1, wv2, bv2)
          + mlp2(x3, wv1, bv1, wv2, bv2)) / 3.0
    feat = jnp.concatenate([hc, hv], axis=-1)
    out = jnp.maximum(feat @ ws + bs, 0.0)
    return jnp.transpose(out, (0, 2, 1))


if __name__ == "__main__":
    key = jax.random.PRNGKey(0)
    k_param, k_c, k_v, k_f = jax.random.split(key, 4)

    # Small shapes; N deliberately NOT a multiple of 128 to exercise the
    # pad-and-slice tail path.
    B, V, N = 2, 32, 240
    params = init_params(k_param)

    centers = jax.random.normal(k_c, (B, 3, N), jnp.float32)
    verts = jax.random.normal(k_v, (B, V, 3), jnp.float32)
    faces = jax.random.randint(k_f, (B, N, 3), 0, V, jnp.int32)

    fwd = jax.jit(spatial_descriptor_forward)
    out = jax.block_until_ready(fwd(centers, verts, faces, params))
    ref = jax.block_until_ready(reference_forward(centers, verts, faces, params))

    assert out.shape == (B, 64, N), out.shape
    # bf16 MXU operands / bf16 inter-stage activations with f32 accumulation
    # vs a pure-f32 reference.
    max_err = float(jnp.max(jnp.abs(out - ref)))
    assert jnp.allclose(out, ref, rtol=5e-2, atol=5e-2), max_err

    print("KERNEL_OK")
</pallas_src>

<mosaic_0001>
module attributes {stable_mosaic.version = 11 : i64} {
  func.func @_spatial_descriptor_kernel(%arg0: i32, %arg1: i32, %arg2: memref<1x12x256xbf16, #tpu.memory_space<vmem>>, %arg3: memref<256x12xbf16, #tpu.memory_space<vmem>>, %arg4: memref<256x1xf32, #tpu.memory_space<vmem>>, %arg5: memref<256x256xbf16, #tpu.memory_space<vmem>>, %arg6: memref<256x1xf32, #tpu.memory_space<vmem>>, %arg7: memref<64x128xbf16, #tpu.memory_space<vmem>>, %arg8: memref<64x1xf32, #tpu.memory_space<vmem>>, %arg9: memref<1x64x256xf32, #tpu.memory_space<vmem>>) attributes {dimension_semantics = [#tpu.dimension_semantics<parallel>, #tpu.dimension_semantics<parallel>], iteration_bounds = array<i64: 2, 1>, scalar_prefetch = 0 : i64, scratch_operands = 0 : i64, tpu.core_type = #tpu.core_type<tc>, window_params = [{transform_indices = @transform_0, window_bounds = array<i64: 1, 12, 256>}, {pipeline_mode = #tpu.pipeline_mode<synchronous>, transform_indices = @transform_1, window_bounds = array<i64: 256, 12>}, {pipeline_mode = #tpu.pipeline_mode<synchronous>, transform_indices = @transform_2, window_bounds = array<i64: 256, 1>}, {pipeline_mode = #tpu.pipeline_mode<synchronous>, transform_indices = @transform_3, window_bounds = array<i64: 256, 256>}, {pipeline_mode = #tpu.pipeline_mode<synchronous>, transform_indices = @transform_4, window_bounds = array<i64: 256, 1>}, {pipeline_mode = #tpu.pipeline_mode<synchronous>, transform_indices = @transform_5, window_bounds = array<i64: 64, 128>}, {pipeline_mode = #tpu.pipeline_mode<synchronous>, transform_indices = @transform_6, window_bounds = array<i64: 64, 1>}, {transform_indices = @transform_7, window_bounds = array<i64: 1, 64, 256>}]} {
    %c0 = arith.constant 0 : index
    %c0_0 = arith.constant 0 : index
    %c0_1 = arith.constant 0 : index
    %0 = vector.load %arg2[%c0, %c0_0, %c0_1] : memref<1x12x256xbf16, #tpu.memory_space<vmem>>, vector<1x12x256xbf16>
    %1 = vector.shape_cast %0 : vector<1x12x256xbf16> to vector<12x256xbf16>
    %c0_2 = arith.constant 0 : index
    %c0_3 = arith.constant 0 : index
    %2 = vector.load %arg3[%c0_2, %c0_3] : memref<256x12xbf16, #tpu.memory_space<vmem>>, vector<256x12xbf16>
    %cst = arith.constant dense<0.000000e+00> : vector<256x256xf32>
    %3 = tpu.matmul %2, %1, %cst {dimension_numbers = #tpu.dot_dimension_numbers<[1], [0], [0], [1], [0, 0, 1, 1], [], []>} : vector<256x12xbf16>, vector<12x256xbf16>, vector<256x256xf32> -> vector<256x256xf32>
    %c0_4 = arith.constant 0 : index
    %c0_5 = arith.constant 0 : index
    %4 = vector.load %arg4[%c0_4, %c0_5] : memref<256x1xf32, #tpu.memory_space<vmem>>, vector<256x1xf32>
    %5 = vector.broadcast %4 : vector<256x1xf32> to vector<256x256xf32>
    %6 = arith.addf %3, %5 : vector<256x256xf32>
    %cst_6 = arith.constant 0.000000e+00 : f32
    %7 = vector.broadcast %cst_6 : f32 to vector<256x256xf32>
    %8 = arith.maximumf %6, %7 : vector<256x256xf32>
    %9 = arith.truncf %8 : vector<256x256xf32> to vector<256x256xbf16>
    %c0_7 = arith.constant 0 : index
    %c0_8 = arith.constant 0 : index
    %10 = vector.load %arg5[%c0_7, %c0_8] : memref<256x256xbf16, #tpu.memory_space<vmem>>, vector<256x256xbf16>
    %cst_9 = arith.constant dense<0.000000e+00> : vector<256x256xf32>
    %11 = tpu.matmul %10, %9, %cst_9 {dimension_numbers = #tpu.dot_dimension_numbers<[1], [0], [0], [1], [0, 0, 1, 1], [], []>} : vector<256x256xbf16>, vector<256x256xbf16>, vector<256x256xf32> -> vector<256x256xf32>
    %c0_10 = arith.constant 0 : index
    %c0_11 = arith.constant 0 : index
    %12 = vector.load %arg6[%c0_10, %c0_11] : memref<256x1xf32, #tpu.memory_space<vmem>>, vector<256x1xf32>
    %13 = vector.broadcast %12 : vector<256x1xf32> to vector<256x256xf32>
    %14 = arith.addf %11, %13 : vector<256x256xf32>
    %cst_12 = arith.constant 0.000000e+00 : f32
    %15 = vector.broadcast %cst_12 : f32 to vector<256x256xf32>
    %16 = arith.maximumf %14, %15 : vector<256x256xf32>
    %17 = vector.extract_strided_slice %16 {offsets = [0, 0], sizes = [64, 256], strides = [1, 1]} : vector<256x256xf32> to vector<64x256xf32>
    %18 = vector.extract_strided_slice %16 {offsets = [64, 0], sizes = [64, 256], strides = [1, 1]} : vector<256x256xf32> to vector<64x256xf32>
    %19 = vector.extract_strided_slice %16 {offsets = [128, 0], sizes = [64, 256], strides = [1, 1]} : vector<256x256xf32> to vector<64x256xf32>
    %20 = arith.addf %18, %19 : vector<64x256xf32>
    %21 = vector.extract_strided_slice %16 {offsets = [192, 0], sizes = [64, 256], strides = [1, 1]} : vector<256x256xf32> to vector<64x256xf32>
    %22 = arith.addf %20, %21 : vector<64x256xf32>
    %23 = tpu.concatenate %17, %22 in 0 : vector<64x256xf32>, vector<64x256xf32> -> vector<128x256xf32>
    %24 = arith.truncf %23 : vector<128x256xf32> to vector<128x256xbf16>
    %c0_13 = arith.constant 0 : index
    %c0_14 = arith.constant 0 : index
    %25 = vector.load %arg7[%c0_13, %c0_14] : memref<64x128xbf16, #tpu.memory_space<vmem>>, vector<64x128xbf16>
    %cst_15 = arith.constant dense<0.000000e+00> : vector<64x256xf32>
    %26 = tpu.matmul %25, %24, %cst_15 {dimension_numbers = #tpu.dot_dimension_numbers<[1], [0], [0], [1], [0, 0, 1, 1], [], []>} : vector<64x128xbf16>, vector<128x256xbf16>, vector<64x256xf32> -> vector<64x256xf32>
    %c0_16 = arith.constant 0 : index
    %c0_17 = arith.constant 0 : index
    %27 = vector.load %arg8[%c0_16, %c0_17] : memref<64x1xf32, #tpu.memory_space<vmem>>, vector<64x1xf32>
    %28 = vector.broadcast %27 : vector<64x1xf32> to vector<64x256xf32>
    %29 = arith.addf %26, %28 : vector<64x256xf32>
    %cst_18 = arith.constant 0.000000e+00 : f32
    %30 = vector.broadcast %cst_18 : f32 to vector<64x256xf32>
    %31 = arith.maximumf %29, %30 : vector<64x256xf32>
    %c0_19 = arith.constant 0 : index
    %c0_20 = arith.constant 0 : index
    %c0_21 = arith.constant 0 : index
    %32 = vector.load %arg9[%c0_19, %c0_20, %c0_21] : memref<1x64x256xf32, #tpu.memory_space<vmem>>, vector<1x64x256xf32>
    %33 = vector.shape_cast %32 : vector<1x64x256xf32> to vector<64x256xf32>
    %34 = vector.shape_cast %31 : vector<64x256xf32> to vector<1x64x256xf32>
    tpu.vector_store %arg9[%c0_19, %c0_20, %c0_21], %34 {strides = array<i32>} : memref<1x64x256xf32, #tpu.memory_space<vmem>>, vector<1x64x256xf32>,
    return
  }
  func.func @transform_0(%arg0: i32, %arg1: i32) -> (i32, i32, i32) {
    %c0_i32 = arith.constant 0 : i32
    %c0_i32_0 = arith.constant 0 : i32
    return %arg0, %c0_i32, %arg1 : i32, i32, i32
  }
  func.func @transform_1(%arg0: i32, %arg1: i32) -> (i32, i32) {
    %c0_i32 = arith.constant 0 : i32
    %c0_i32_0 = arith.constant 0 : i32
    %c0_i32_1 = arith.constant 0 : i32
    return %c0_i32, %c0_i32_0 : i32, i32
  }
  func.func @transform_2(%arg0: i32, %arg1: i32) -> (i32, i32) {
    %c0_i32 = arith.constant 0 : i32
    %c0_i32_0 = arith.constant 0 : i32
    %c0_i32_1 = arith.constant 0 : i32
    return %c0_i32, %c0_i32_0 : i32, i32
  }
  func.func @transform_3(%arg0: i32, %arg1: i32) -> (i32, i32) {
    %c0_i32 = arith.constant 0 : i32
    %c0_i32_0 = arith.constant 0 : i32
    %c0_i32_1 = arith.constant 0 : i32
    return %c0_i32, %c0_i32_0 : i32, i32
  }
  func.func @transform_4(%arg0: i32, %arg1: i32) -> (i32, i32) {
    %c0_i32 = arith.constant 0 : i32
    %c0_i32_0 = arith.constant 0 : i32
    %c0_i32_1 = arith.constant 0 : i32
    return %c0_i32, %c0_i32_0 : i32, i32
  }
  func.func @transform_5(%arg0: i32, %arg1: i32) -> (i32, i32) {
    %c0_i32 = arith.constant 0 : i32
    %c0_i32_0 = arith.constant 0 : i32
    %c0_i32_1 = arith.constant 0 : i32
    return %c0_i32, %c0_i32_0 : i32, i32
  }
  func.func @transform_6(%arg0: i32, %arg1: i32) -> (i32, i32) {
    %c0_i32 = arith.constant 0 : i32
    %c0_i32_0 = arith.constant 0 : i32
    %c0_i32_1 = arith.constant 0 : i32
    return %c0_i32, %c0_i32_0 : i32, i32
  }
  func.func @transform_7(%arg0: i32, %arg1: i32) -> (i32, i32, i32) {
    %c0_i32 = arith.constant 0 : i32
    %c0_i32_0 = arith.constant 0 : i32
    return %arg0, %c0_i32, %arg1 : i32, i32, i32
  }
}

</mosaic_0001>

<bundles_post_ra>
// kernel: spatial_descriptor_forward.1
= control target key start
LH: loop header
LB: loop body
LE: loop exit
PB: predicated region body
PF: predicated region fallthrough
CT: control target
= control target key end

     0   :  { %12 = vsyncpa [#allocation3], 0  ;;  %s2922_s0 = inlined_call_operand.vmem [shape: bf16[2,12,256], index: 0, kind: input, shape index: {}]   ;;  %s2923_s1 = inlined_call_operand.vmem [shape: bf16[256,12], index: 1, kind: input, shape index: {}]   ;;  %s2924_s2 = inlined_call_operand.vmem [shape: f32[256,1], index: 2, kind: input, shape index: {}]   ;;  %s2925_s3 = inlined_call_operand.vmem [shape: bf16[256,256], index: 3, kind: input, shape index: {}]   ;;  %s2926_s4 = inlined_call_operand.vmem [shape: f32[256,1], index: 4, kind: input, shape index: {}]   ;;  %s2927_s5 = inlined_call_operand.vmem [shape: bf16[64,128], index: 5, kind: input, shape index: {}]   ;;  %s2928_s6 = inlined_call_operand.vmem [shape: f32[64,1], index: 6, kind: input, shape index: {}]   ;;  %s2929_s7 = inlined_call_operand.hbm [shape: f32[2,64,256], index: 7, kind: output, shape index: {}]  }
   0x1   :  { %14 = vsyncpa [#allocation3 + $0x1], 0  ;;  %s2278_s24 = smov 0   ;;  %s2280_s25 = smov 0  }
   0x2   :  { %s2282_s26 = smov 0   ;;  %s2284_s27 = smov 0  }
   0x3   :  { %s2286_s28 = smov 0   ;;  %s2288_s29 = smov 0  }
   0x4 LB: > { %s1937_s30 = sadd.s32 4294967295, %s2232_s29   ;;  %s1938_s8 = sadd.s32 4294967294, %s2232_s29   ;;  %s2232_s29 = sphi %s2288_s29, %s20_s29   ;;  %s2228_s28 = sphi %s2286_s28, %s2936_s28   ;;  %s2224_s27 = sphi %s2284_s27, %s2935_s27   ;;  %s2220_s26 = sphi %s2282_s26, %s2934_s26   ;;  %s2216_s25 = sphi %s2280_s25, %s2933_s25   ;;  %s2212_s24 = sphi %s2278_s24, %s2932_s24  }
   0x5   : > { %s32_s9 = sadd.s32 1, %s2228_s28  ;;  %s195_s10 = sadd.s32 1, %s2220_s26 }
   0x6   : > { %p34_p0 = scmp.ge.s32.totalorder %s32_s9, 2  ;;  %p205_p1 = scmp.ne.s32.totalorder %s2220_s26, %s2216_s25 }
   0x7   : > { %p206_p2 = scmp.eq.s32.totalorder %s1937_s30, 1  ;;  %p211_p3 = scmp.ne.s32.totalorder %s2216_s25, %s2212_s24 }
   0x8   : > { %s2938_s9 = smov (%p34_p0, %s32_s9), 0  ;;  %p212_p5 = scmp.eq.s32.totalorder %s1938_s8, 1 }
   0x9   : > { %p2318_p4 = por %p206_p2, %p205_p1  ;;  %s190_s12 = ssub.s32 %s2228_s28, %s2938_s9 }
   0xa   : > { %p1941_p6 = scmp.ge.s32.totalorder %s2232_s29, 1  ;;  %p193_p7 = scmp.eq.s32.totalorder %s190_s12, 0 }
   0xb   : > { %p2325_p8 = por %p212_p5, %p211_p3  ;;  %p261_p9 = scmp.lt.s32.totalorder %s2232_s29, 3 }
   0xc   : > { %s2331_s14 = scalar_select %p193_p7, %s2220_s26, %s195_s10  }
   0xd   : > { %p262_p10 = pnand %p1941_p6, %p261_p9 }
   0xe   : > { %p298_p11 = scmp.lt.s32.totalorder (!%p262_p10), %s2224_s27, 1  ;;  %v2234_v0 = vmov (!%p262_p10), 0   ;;  %v343_v1 = vld [vmem:[%s2924_s2] sm:$0xff] (!%p262_p10)  ;;  %v345_v2 = vld [vmem:[%s2924_s2 + $0x10] sm:$0xff] (!%p262_p10)  ;;  %v344_v3 = vld [vmem:[%s2924_s2 + $0x8] sm:$0xff] (!%p262_p10)  ;;  %vm672_vm0 = vcmask (!%p262_p10), 1045504  }
   0xf   : > { %265 = sbr.rel (%p262_p10) target bundleno = 981 (0x3d5), region = 48  ;;  %711 = vmatprep.mubr.bf16.mxu0 (!%p262_p10), %v2234_v0  ;;  %2081 = vset.pattern.permute.xlu0 (!%p262_p10), %v2234_v0  ;;  %v346_v4 = vld [vmem:[%s2924_s2 + $0x18] sm:$0xff] (!%p262_p10)  ;;  %v347_v7 = vld [vmem:[%s2924_s2 + $0x20] sm:$0xff] (!%p262_p10)  ;;  %v348_v8 = vld [vmem:[%s2924_s2 + $0x28] sm:$0xff] (!%p262_p10)  ;;  %vm623_vm1 = vcmask (!%p262_p10), 97280   ;;  %s294_s21 = sand.u32 (!%p262_p10), 1, %s2216_s25  }
  0x10   : > { %377 = vperm.xlu0 (!%p262_p10), %2081, %v343_v1   ;;  %2082 = vset.pattern.permute.xlu1 (!%p262_p10), %v2234_v0  ;;  %v2086_v10 = vld [vmem:[%s2923_s1] sm:$0xff] (!%p262_p10)   ;;  %v349_v11 = vld [vmem:[%s2924_s2 + $0x30] sm:$0xff] (!%p262_p10)  ;;  %v350_v12 = vld [vmem:[%s2924_s2 + $0x38] sm:$0xff] (!%p262_p10)  ;;  %s2022_s30 = sshll.u32 (!%p262_p10), %s2224_s27, 11  ;;  %s2235_s17 = smov (!%p262_p10), [#allocation2]  }
  0x11   : > { %387 = vperm.xlu1 (!%p262_p10), %2082, %v345_v2   ;;  %v351_v13 = vld [vmem:[%s2924_s2 + $0x40] sm:$0xff] (!%p262_p10)  ;;  %v352_v14 = vld [vmem:[%s2924_s2 + $0x48] sm:$0xff] (!%p262_p10)  ;;  %v353_v16 = vld [vmem:[%s2924_s2 + $0x50] sm:$0xff] (!%p262_p10)  ;;  %s2867_s15 = scalar_lea.hbm (!%p262_p10), %s2929_s7, %s2022_s30  ;;  %s2158_s18 = sshll.u32 (!%p262_p10), %s2235_s17, 4  ;;  %s2159_s18 = int_to_ptr.vmem [resolvable:$false] %s2158_s18 }
  0x12   : > { %v2087_v15 = vld [vmem:[%s2923_s1 + $0x8] sm:$0xff] (!%p262_p10)   ;;  %v354_v17 = vld [vmem:[%s2924_s2 + $0x58] sm:$0xff] (!%p262_p10)  ;;  %v355_v18 = vld [vmem:[%s2924_s2 + $0x60] sm:$0xff] (!%p262_p10) }
  0x13   : > { %v356_v19 = vld [vmem:[%s2924_s2 + $0x68] sm:$0xff] (!%p262_p10)  ;;  %v2088_v20 = vld [vmem:[%s2923_s1 + $0x10] sm:$0xff] (!%p262_p10)   ;;  %v358_v22 = vld [vmem:[%s2924_s2 + $0x78] sm:$0xff] (!%p262_p10) }
  0x14   : > { %382 = vperm.xlu0 (!%p262_p10), %2081, %v344_v3   ;;  %v357_v21 = vld [vmem:[%s2924_s2 + $0x70] sm:$0xff] (!%p262_p10)  ;;  %v359_v23 = vld [vmem:[%s2924_s2 + $0x80] sm:$0xff] (!%p262_p10)  ;;  %v360_v24 = vld [vmem:[%s2924_s2 + $0x88] sm:$0xff] (!%p262_p10) }
  0x15   : > { %392 = vperm.xlu1 (!%p262_p10), %2082, %v346_v4   ;;  %v2089_v25 = vld [vmem:[%s2923_s1 + $0x18] sm:$0xff] (!%p262_p10)   ;;  %v361_v26 = vld [vmem:[%s2924_s2 + $0x90] sm:$0xff] (!%p262_p10)  ;;  %v363_v28 = vld [vmem:[%s2924_s2 + $0xa0] sm:$0xff] (!%p262_p10) }
  0x16   : > { %s299_s19 = scalar_select %p298_p11, %s2224_s27, 1  ;;  %v362_v27 = vld [vmem:[%s2924_s2 + $0x98] sm:$0xff]  ;;  %v364_v29 = vld [vmem:[%s2924_s2 + $0xa8] sm:$0xff]  ;;  %v2090_v30 = vld [vmem:[%s2923_s1 + $0x20] sm:$0xff]  }
  0x17   : > { %v365_v31 = vld [vmem:[%s2924_s2 + $0xb0] sm:$0xff]  ;;  %v366_v32 = vld [vmem:[%s2924_s2 + $0xb8] sm:$0xff]  ;;  %v367_v33 = vld [vmem:[%s2924_s2 + $0xc0] sm:$0xff]  ;;  %s2876_s27 = scalar_lea.sflag [#allocation3], %s294_s21 }
  0x18   : > { %s2021_s22 = sshll.u32 %s299_s19, 4  ;;  %397 = vperm.xlu0 %2081, %v347_v7   ;;  %v368_v34 = vld [vmem:[%s2924_s2 + $0xc8] sm:$0xff]  ;;  %v369_v36 = vld [vmem:[%s2924_s2 + $0xd0] sm:$0xff]  ;;  %v370_v37 = vld [vmem:[%s2924_s2 + $0xd8] sm:$0xff]  ;;  %s2160_s19 = scalar_lea.vmem %s2159_s18, 4096 }
  0x19   : > { %s305_s12 = scalar_lea.vmem %s2922_s0, %s2021_s22  ;;  %402 = vperm.xlu1 %2082, %v348_v8   ;;  %v2091_v35 = vld [vmem:[%s2923_s1 + $0x28] sm:$0xff]   ;;  %v371_v38 = vld [vmem:[%s2924_s2 + $0xe0] sm:$0xff]  ;;  %v2092_v40 = vld [vmem:[%s2923_s1 + $0x30] sm:$0xff]   ;;  %s1942_s22 = sshll.u32 %s294_s21, 7 }
  0x1a   : > { %v2083_v5 = vld [vmem:[%s305_s12 + $0x4] ss:$8 sps:$4 sm:$0x3f]   ;;  %v2085_v6 = vld [vmem:[%s305_s12] ss:$8 sps:$4 sm:$0x3f]  }
  0x1b   : > { %1963 = vmatprep.subr.msk.bf16.mxu0 %vm672_vm0, %v2083_v5  ;;  %v674_v9 = vsel %vm672_vm0, %v2085_v6, 0  ;;  %v372_v39 = vld [vmem:[%s2924_s2 + $0xe8] sm:$0xff]  ;;  %v373_v41 = vld [vmem:[%s2924_s2 + $0xf0] sm:$0xff]  ;;  %v374_v42 = vld [vmem:[%s2924_s2 + $0xf8] sm:$0xff]  ;;  %s2847_s23 = scalar_lea.vmem [#allocation2], %s1942_s22 }
  0x1c   : > { %680 = vmatpush1.bf16.msra.mxu0 %v674_v9  ;;  %407 = vperm.xlu0 %2081, %v349_v11   ;;  %v1000_v43 = vld [vmem:[%s2926_s4] sm:$0xff]  ;;  %v1001_v44 = vld [vmem:[%s2926_s4 + $0x8] sm:$0xff]  ;;  %v2093_v45 = vld [vmem:[%s2923_s1 + $0x38] sm:$0xff]   ;;  %s1858_s8 = sshll.u32 %s2847_s23, 4  ;;  %s2869_s8 = int_to_ptr.vmem [resolvable:$true] %s1858_s8 }
  0x1d   : > { %412 = vperm.xlu1 %2082, %v350_v12   ;;  %v1002_v46 = vld [vmem:[%s2926_s4 + $0x10] sm:$0xff]  ;;  %v1003_v47 = vld [vmem:[%s2926_s4 + $0x18] sm:$0xff]  ;;  %v1004_v48 = vld [vmem:[%s2926_s4 + $0x20] sm:$0xff]  ;;  %s2154_s16 = scalar_lea.vmem %s2869_s8, 2048  ;;  %p2161_p1 = scmp.lt.s32.totalorder %s2869_s8, %s2159_s18 }
  0x1e   : > { %v1005_v49 = vld [vmem:[%s2926_s4 + $0x28] sm:$0xff]  ;;  %v2094_v50 = vld [vmem:[%s2923_s1 + $0x40] sm:$0xff]   ;;  %v1006_v51 = vld [vmem:[%s2926_s4 + $0x30] sm:$0xff]  ;;  %p2155_p12 = scmp.ne.s32.totalorder %s2869_s8, %s2154_s16  ;;  %p2162_p2 = scmp.lt.s32.totalorder %s2160_s19, %s2154_s16 }
  0x1f   : > { %1964 = vmatmul.mubr.msk.bf16.vlgmr.msra.gmra.mrb[0].mxu0 %vm623_vm1, %v2086_v10  ;;  %v1007_v52 = vld [vmem:[%s2926_s4 + $0x38] sm:$0xff]  ;;  %v1008_v53 = vld [vmem:[%s2926_s4 + $0x40] sm:$0xff]  ;;  %v1009_v54 = vld [vmem:[%s2926_s4 + $0x48] sm:$0xff] }
  0x20   : > { %721 = vmatprep.mubr.bf16.mxu0 %v2234_v0  ;;  %417 = vperm.xlu0 %2081, %v351_v13   ;;  %v2095_v55 = vld [vmem:[%s2923_s1 + $0x48] sm:$0xff]   ;;  %v1016_v56 = vld [vmem:[%s2926_s4 + $0x80] sm:$0xff]  ;;  %v2096_v60 = vld [vmem:[%s2923_s1 + $0x50] sm:$0xff]   ;;  %p2156_p13 = pnand %p2155_p12, %p2318_p4  ;;  %p2163_p3 = por %p2162_p2, %p2161_p1 }
  0x21   : > { %422 = vperm.xlu1 %2082, %v352_v14   ;;  %v1017_v57 = vld [vmem:[%s2926_s4 + $0x88] sm:$0xff]  ;;  %v1024_v58 = vld [vmem:[%s2926_s4 + $0xc0] sm:$0xff]  ;;  %v1010_v61 = vld [vmem:[%s2926_s4 + $0x50] sm:$0xff] }
  0x22   : > { %v1025_v59 = vld [vmem:[%s2926_s4 + $0xc8] sm:$0xff]  ;;  %v1011_v62 = vld [vmem:[%s2926_s4 + $0x58] sm:$0xff]  ;;  %v1018_v63 = vld [vmem:[%s2926_s4 + $0x90] sm:$0xff]  ;;  %p2157_p0 = pneg %p2156_p13 }
  0x23   : > { %v1019_v1 = vld [vmem:[%s2926_s4 + $0x98] sm:$0xff]  ;;  %v1026_v3 = vld [vmem:[%s2926_s4 + $0xd0] sm:$0xff]  ;;  %v1012_v5 = vld [vmem:[%s2926_s4 + $0x60] sm:$0xff] }
  0x24   : > { %427 = vperm.xlu0 %2081, %v353_v16   ;;  %v2097_v2 = vld [vmem:[%s2923_s1 + $0x58] sm:$0xff]   ;;  %v1013_v6 = vld [vmem:[%s2926_s4 + $0x68] sm:$0xff]  ;;  %v2098_v7 = vld [vmem:[%s2923_s1 + $0x60] sm:$0xff]   ;;  %p2164_p5 = pnand %p2163_p3, %p2157_p0 }
  0x25   : > { %432 = vperm.xlu1 %2082, %v354_v17   ;;  %v1027_v4 = vld [vmem:[%s2926_s4 + $0xd8] sm:$0xff]  ;;  %v1020_v8 = vld [vmem:[%s2926_s4 + $0xa0] sm:$0xff]  ;;  %v1021_v9 = vld [vmem:[%s2926_s4 + $0xa8] sm:$0xff] }
  0x26   : > { %v1028_v10 = vld [vmem:[%s2926_s4 + $0xe0] sm:$0xff]  ;;  %v1029_v11 = vld [vmem:[%s2926_s4 + $0xe8] sm:$0xff]  ;;  %v1014_v13 = vld [vmem:[%s2926_s4 + $0x70] sm:$0xff] }
  0x27   : > { %1965 = vmatmul.mubr.msk.bf16.gmra.mrb[4].mxu0 %vm623_vm1, %v2087_v15  ;;  %v2099_v12 = vld [vmem:[%s2923_s1 + $0x68] sm:$0xff]   ;;  %v1015_v14 = vld [vmem:[%s2926_s4 + $0x78] sm:$0xff]  ;;  %v1022_v15 = vld [vmem:[%s2926_s4 + $0xb0] sm:$0xff] }
  0x28   : > { %731 = vmatprep.mubr.bf16.mxu0 %v2234_v0  ;;  %437 = vperm.xlu0 %2081, %v355_v18   ;;  %v1023_v16 = vld [vmem:[%s2926_s4 + $0xb8] sm:$0xff]  ;;  %v2100_v17 = vld [vmem:[%s2923_s1 + $0x70] sm:$0xff]  }
  0x29   : > { %442 = vperm.xlu1 %2082, %v356_v19   ;;  %v1030_v18 = vld [vmem:[%s2926_s4 + $0xf0] sm:$0xff]  ;;  %v1031_v19 = vld [vmem:[%s2926_s4 + $0xf8] sm:$0xff] }
  0x2c   : > { %447 = vperm.xlu0 %2081, %v357_v21   ;;  %v1666_v21 = vld [vmem:[%s2928_s6 + $0x8] sm:$0xff] }
  0x2d   : > { %452 = vperm.xlu1 %2082, %v358_v22   ;;  %v2101_v22 = vld [vmem:[%s2923_s1 + $0x78] sm:$0xff]  }
  0x2f   : > { %1966 = vmatmul.mubr.msk.bf16.gmra.mrb[8].mxu0 %vm623_vm1, %v2088_v20  ;;  %v1665_v20 = vld [vmem:[%s2928_s6] sm:$0xff] }
  0x30   : > { %741 = vmatprep.mubr.bf16.mxu0 %v2234_v0  ;;  %457 = vperm.xlu0 %2081, %v359_v23   ;;  %v1667_v23 = vld [vmem:[%s2928_s6 + $0x10] sm:$0xff] }
  0x31   : > { %462 = vperm.xlu1 %2082, %v360_v24   ;;  %v1668_v24 = vld [vmem:[%s2928_s6 + $0x18] sm:$0xff] }
  0x34   : > { %467 = vperm.xlu0 %2081, %v361_v26   ;;  %v1670_v26 = vld [vmem:[%s2928_s6 + $0x28] sm:$0xff] }
  0x35   : > { %472 = vperm.xlu1 %2082, %v362_v27   ;;  %v1671_v27 = vld [vmem:[%s2928_s6 + $0x30] sm:$0xff] }
  0x37   : > { %1967 = vmatmul.mubr.msk.bf16.gmra.mrb[12].mxu0 %vm623_vm1, %v2089_v25  ;;  %v1669_v25 = vld [vmem:[%s2928_s6 + $0x20] sm:$0xff] }
  0x38   : > { %751 = vmatprep.mubr.bf16.mxu0 %v2234_v0  ;;  %477 = vperm.xlu0 %2081, %v363_v28   ;;  %v1672_v28 = vld [vmem:[%s2928_s6 + $0x38] sm:$0xff] }
  0x39   : > { %482 = vperm.xlu1 %2082, %v364_v29  }
  0x3c   : > { %487 = vperm.xlu0 %2081, %v365_v31  }
  0x3d   : > { %492 = vperm.xlu1 %2082, %v366_v32  }
  0x3f   : > { %1968 = vmatmul.mubr.msk.bf16.gmra.mrb[16].mxu0 %vm623_vm1, %v2090_v30 }
  0x40   : > { %761 = vmatprep.mubr.bf16.mxu0 %v2234_v0  ;;  %497 = vperm.xlu0 %2081, %v367_v33  }
  0x41   : > { %502 = vperm.xlu1 %2082, %v368_v34  }
  0x44   : > { %507 = vperm.xlu0 %2081, %v369_v36  }
  0x45   : > { %512 = vperm.xlu1 %2082, %v370_v37  }
  0x47   : > { %1969 = vmatmul.mubr.msk.bf16.gmra.mrb[20].mxu0 %vm623_vm1, %v2091_v35 }
  0x48   : > { %771 = vmatprep.mubr.bf16.mxu0 %v2234_v0  ;;  %517 = vperm.xlu0 %2081, %v371_v38   ;;  %v2104_v38 = vld [vmem:[%s2925_s3 + $0x4] ss:$8 sps:$4 sm:$0xff]  }
  0x49   : > { %522 = vperm.xlu1 %2082, %v372_v39   ;;  %1384 = vmatprep.mubr.bf16.mxu1 %v2104_v38 }
  0x4c   : > { %527 = vperm.xlu0 %2081, %v373_v41  }
  0x4d   : > { %532 = vperm.xlu1 %2082, %v374_v42  }
  0x4f   : > { %1970 = vmatmul.mubr.msk.bf16.gmra.mrb[24].mxu0 %vm623_vm1, %v2092_v40 }
  0x50   : > { %781 = vmatprep.mubr.bf16.mxu0 %v2234_v0  ;;  %1034 = vperm.xlu0 %2081, %v1000_v43  }
  0x51   : > { %1039 = vperm.xlu1 %2082, %v1001_v44  }
  0x54   : > { %1044 = vperm.xlu0 %2081, %v1002_v46  }
  0x55   : > { %1049 = vperm.xlu1 %2082, %v1003_v47  }
  0x57   : > { %1971 = vmatmul.mubr.msk.bf16.gmra.mrb[28].mxu0 %vm623_vm1, %v2093_v45 }
  0x58   : > { %791 = vmatprep.mubr.bf16.mxu0 %v2234_v0  ;;  %1054 = vperm.xlu0 %2081, %v1004_v48  }
  0x59   : > { %1059 = vperm.xlu1 %2082, %v1005_v49  }
  0x5c   : > { %1064 = vperm.xlu0 %2081, %v1006_v51  }
  0x5d   : > { %1069 = vperm.xlu1 %2082, %v1007_v52  }
  0x5f   : > { %1972 = vmatmul.mubr.msk.bf16.gmra.mrb[32].mxu0 %vm623_vm1, %v2094_v50 }
  0x60   : > { %801 = vmatprep.mubr.bf16.mxu0 %v2234_v0  ;;  %1074 = vperm.xlu0 %2081, %v1008_v53  }
  0x61   : > { %1079 = vperm.xlu1 %2082, %v1009_v54  }
  0x64   : > { %1114 = vperm.xlu0 %2081, %v1016_v56  }
  0x65   : > { %1119 = vperm.xlu1 %2082, %v1017_v57  }
  0x67   : > { %1973 = vmatmul.mubr.msk.bf16.gmra.mrb[36].mxu0 %vm623_vm1, %v2095_v55 }
  0x68   : > { %811 = vmatprep.mubr.bf16.mxu0 %v2234_v0  ;;  %1154 = vperm.xlu0 %2081, %v1024_v58  }
  0x69   : > { %1159 = vperm.xlu1 %2082, %v1025_v59  }
  0x6c   : > { %1084 = vperm.xlu0 %2081, %v1010_v61  }
  0x6d   : > { %1089 = vperm.xlu1 %2082, %v1011_v62  }
  0x6f   : > { %1974 = vmatmul.mubr.msk.bf16.gmra.mrb[40].mxu0 %vm623_vm1, %v2096_v60 }
  0x70   : > { %821 = vmatprep.mubr.bf16.mxu0 %v2234_v0  ;;  %1124 = vperm.xlu0 %2081, %v1018_v63  }
  0x71   : > { %1129 = vperm.xlu1 %2082, %v1019_v1  }
  0x74   : > { %1164 = vperm.xlu0 %2081, %v1026_v3  }
  0x75   : > { %1169 = vperm.xlu1 %2082, %v1027_v4  }
  0x77   : > { %1975 = vmatmul.mubr.msk.bf16.gmra.mrb[44].mxu0 %vm623_vm1, %v2097_v2 }
  0x78   : > { %831 = vmatprep.mubr.bf16.mxu0 %v2234_v0  ;;  %1094 = vperm.xlu0 %2081, %v1012_v5  }
  0x79   : > { %1099 = vperm.xlu1 %2082, %v1013_v6  }
  0x7c   : > { %1134 = vperm.xlu0 %2081, %v1020_v8  }
  0x7d   : > { %1139 = vperm.xlu1 %2082, %v1021_v9  }
  0x7f   : > { %1976 = vmatmul.mubr.msk.bf16.gmra.mrb[48].mxu0 %vm623_vm1, %v2098_v7 }
  0x80   : > { %841 = vmatprep.mubr.bf16.mxu0 %v2234_v0  ;;  %1174 = vperm.xlu0 %2081, %v1028_v10  }
  0x81   : > { %1179 = vperm.xlu1 %2082, %v1029_v11  }
  0x84   : > { %1104 = vperm.xlu0 %2081, %v1014_v13  }
  0x85   : > { %1109 = vperm.xlu1 %2082, %v1015_v14  }
  0x87   : > { %1977 = vmatmul.mubr.msk.bf16.gmra.mrb[52].mxu0 %vm623_vm1, %v2099_v12 }
  0x88   : > { %851 = vmatprep.mubr.bf16.mxu0 %v2234_v0  ;;  %1144 = vperm.xlu0 %2081, %v1022_v15  }
  0x89   : > { %1149 = vperm.xlu1 %2082, %v1023_v16  }
  0x8c   : > { %1184 = vperm.xlu0 %2081, %v1030_v18  }
  0x8d   : > { %1189 = vperm.xlu1 %2082, %v1031_v19  }
  0x8f   : > { %1978 = vmatmul.mubr.msk.bf16.gmra.mrb[56].mxu0 %vm623_vm1, %v2100_v17  ;;  %v378_v29 = vpop.permute.xlu0 %377 }
  0x90   : > { %861 = vmatprep.mubr.bf16.mxu0 %v2234_v0  ;;  %1675 = vperm.xlu0 %2081, %v1665_v20   ;;  %v388_v39 = vpop.permute.xlu1 %387 }
  0x91   : > { %1680 = vperm.xlu1 %2082, %v1666_v21  }
  0x93   : > { %v383_v33 = vpop.permute.xlu0 %382 }
  0x94   : > { %1685 = vperm.xlu0 %2081, %v1667_v23   ;;  %v393_v50 = vpop.permute.xlu1 %392 }
  0x95   : > { %1690 = vperm.xlu1 %2082, %v1668_v24  }
  0x97   : > { %1979 = vmatmul.mubr.msk.bf16.gmra.mrb[60].mxu0 %vm623_vm1, %v2101_v22  ;;  %v398_v61 = vpop.permute.xlu0 %397 }
  0x98   : > { %1769 = vmatprep.mubr.bf16.mxu0 %v2234_v0  ;;  %1695 = vperm.xlu0 %2081, %v1669_v25   ;;  %v403_v3 = vpop.permute.xlu1 %402 }
  0x99   : > { %1700 = vperm.xlu1 %2082, %v1670_v26  }
  0x9b   : > { %v408_v14 = vpop.permute.xlu0 %407 }
  0x9c   : > { %1705 = vperm.xlu0 %2081, %v1671_v27   ;;  %v413_v19 = vpop.permute.xlu1 %412 }
  0x9d   : > { %1710 = vperm.xlu1 %2082, %v1672_v28  }
  0xf2   : > { %v713_v30 = vpop.f32.mrb[0].mxu0 }
  0xf3   : > { %v714_v31 = vadd.f32 %v713_v30, %v378_v29  ;;  %v715_v32 = vpop.f32.mrb[1].mxu0  ;;  %v418_v30 = vpop.permute.xlu0 %417 }
  0xf4   : > { %v716_v34 = vadd.f32 %v715_v32, %v378_v29  ;;  %v717_v35 = vpop.f32.mrb[2].mxu0 }
  0xf5   : > { %v718_v36 = vadd.f32 %v717_v35, %v383_v33  ;;  %v719_v37 = vpop.f32.mrb[3].mxu0  ;;  %v872_v41 = vmax.f32 %v714_v31, 0.0  ;;  %v423_v35 = vpop.permute.xlu1 %422 }
  0xf6   : > { %v720_v40 = vadd.f32 %v719_v37, %v383_v33  ;;  %v873_v43 = vmax.f32 %v716_v34, 0.0 }
  0xf7   : > { %v874_v42 = vmax.f32 %v718_v36, 0.0 }
  0xf8   : > { %v875_v44 = vmax.f32 %v720_v40, 0.0 }
  0xf9   : > { %v936_v45 = vpack.c.bf16 %v874_v42, %v872_v41 }
  0xfa   : > { %v723_v46 = vpop.f32.mrb[4].mxu0  ;;  %v937_v47 = vpack.c.bf16 %v875_v44, %v873_v43 }
  0xfb   : > { %v724_v48 = vadd.f32 %v723_v46, %v388_v39  ;;  %v725_v49 = vpop.f32.mrb[5].mxu0  ;;  %v428_v46 = vpop.permute.xlu0 %427 }
  0xfc   : > { %v726_v51 = vadd.f32 %v725_v49, %v388_v39  ;;  %v727_v52 = vpop.f32.mrb[6].mxu0  ;;  %1352 = vmatprep.subr.bf16.mxu1 %v937_v47 }
  0xfd   : > { %v728_v53 = vadd.f32 %v727_v52, %v393_v50  ;;  %v729_v54 = vpop.f32.mrb[7].mxu0  ;;  %1353 = vmatpush1.bf16.msra.mxu1 %v936_v45  ;;  %v876_v56 = vmax.f32 %v724_v48, 0.0 }
  0xfe   : > { %v730_v55 = vadd.f32 %v729_v54, %v393_v50  ;;  %v877_v58 = vmax.f32 %v726_v51, 0.0  ;;  %v433_v51 = vpop.permute.xlu1 %432 }
  0xff   : > { %v878_v57 = vmax.f32 %v728_v53, 0.0 }
 0x100   : > { %v879_v59 = vmax.f32 %v730_v55, 0.0 }
 0x101   : > { %v938_v60 = vpack.c.bf16 %v878_v57, %v876_v56 }
 0x102   : > { %v939_v62 = vpack.c.bf16 %v879_v59, %v877_v58  ;;  %v733_v63 = vpop.f32.mrb[8].mxu0 }
 0x103   : > { %v734_v1 = vadd.f32 %v733_v63, %v398_v61  ;;  %v735_v2 = vpop.f32.mrb[9].mxu0 }
 0x104   : > { %v736_v4 = vadd.f32 %v735_v2, %v398_v61  ;;  %v737_v5 = vpop.f32.mrb[10].mxu0  ;;  %1354 = vmatprep.subr.bf16.mxu1 %v939_v62  ;;  %v438_v62 = vpop.permute.xlu0 %437 }
 0x105   : > { %v738_v6 = vadd.f32 %v737_v5, %v403_v3  ;;  %v739_v7 = vpop.f32.mrb[11].mxu0  ;;  %1355 = vmatpush1.bf16.msra.mxu1 %v938_v60  ;;  %v880_v9 = vmax.f32 %v734_v1, 0.0 }
 0x106   : > { %v740_v8 = vadd.f32 %v739_v7, %v403_v3  ;;  %v881_v11 = vmax.f32 %v736_v4, 0.0  ;;  %v443_v4 = vpop.permute.xlu1 %442 }
 0x107   : > { %v882_v10 = vmax.f32 %v738_v6, 0.0 }
 0x108   : > { %v883_v12 = vmax.f32 %v740_v8, 0.0 }
 0x109   : > { %v940_v13 = vpack.c.bf16 %v882_v10, %v880_v9 }
 0x10a   : > { %v941_v15 = vpack.c.bf16 %v883_v12, %v881_v11  ;;  %v743_v16 = vpop.f32.mrb[12].mxu0 }
 0x10b   : > { %v744_v17 = vadd.f32 %v743_v16, %v408_v14  ;;  %v745_v18 = vpop.f32.mrb[13].mxu0 }
 0x10c   : > { %v746_v20 = vadd.f32 %v745_v18, %v408_v14  ;;  %v747_v21 = vpop.f32.mrb[14].mxu0  ;;  %1356 = vmatprep.subr.bf16.mxu1 %v941_v15  ;;  %v448_v15 = vpop.permute.xlu0 %447 }
 0x10d   : > { %v748_v22 = vadd.f32 %v747_v21, %v413_v19  ;;  %v749_v23 = vpop.f32.mrb[15].mxu0  ;;  %1357 = vmatpush1.bf16.msra.mxu1 %v940_v13  ;;  %v884_v25 = vmax.f32 %v744_v17, 0.0 }
 0x10e   : > { %v750_v24 = vadd.f32 %v749_v23, %v413_v19  ;;  %v885_v27 = vmax.f32 %v746_v20, 0.0  ;;  %v453_v20 = vpop.permute.xlu1 %452 }
 0x10f   : > { %v886_v26 = vmax.f32 %v748_v22, 0.0 }
 0x110   : > { %v887_v28 = vmax.f32 %v750_v24, 0.0 }
 0x111   : > { %v942_v29 = vpack.c.bf16 %v886_v26, %v884_v25 }
 0x112   : > { %v943_v31 = vpack.c.bf16 %v887_v28, %v885_v27  ;;  %v753_v32 = vpop.f32.mrb[16].mxu0 }
 0x113   : > { %v754_v33 = vadd.f32 %v753_v32, %v418_v30  ;;  %v755_v34 = vpop.f32.mrb[17].mxu0 }
 0x114   : > { %v756_v36 = vadd.f32 %v755_v34, %v418_v30  ;;  %v757_v37 = vpop.f32.mrb[18].mxu0  ;;  %1358 = vmatprep.subr.bf16.mxu1 %v943_v31  ;;  %v458_v31 = vpop.permute.xlu0 %457 }
 0x115   : > { %v758_v38 = vadd.f32 %v757_v37, %v423_v35  ;;  %v759_v39 = vpop.f32.mrb[19].mxu0  ;;  %1359 = vmatpush1.bf16.msra.mxu1 %v942_v29  ;;  %v888_v41 = vmax.f32 %v754_v33, 0.0 }
 0x116   : > { %v760_v40 = vadd.f32 %v759_v39, %v423_v35  ;;  %v889_v43 = vmax.f32 %v756_v36, 0.0  ;;  %v463_v36 = vpop.permute.xlu1 %462 }
 0x117   : > { %v890_v42 = vmax.f32 %v758_v38, 0.0 }
 0x118   : > { %v891_v44 = vmax.f32 %v760_v40, 0.0 }
 0x119   : > { %v944_v45 = vpack.c.bf16 %v890_v42, %v888_v41 }
 0x11a   : > { %v945_v47 = vpack.c.bf16 %v891_v44, %v889_v43  ;;  %v763_v48 = vpop.f32.mrb[20].mxu0 }
 0x11b   : > { %v764_v49 = vadd.f32 %v763_v48, %v428_v46  ;;  %v765_v50 = vpop.f32.mrb[21].mxu0 }
 0x11c   : > { %v766_v52 = vadd.f32 %v765_v50, %v428_v46  ;;  %v767_v53 = vpop.f32.mrb[22].mxu0  ;;  %1360 = vmatprep.subr.bf16.mxu1 %v945_v47  ;;  %v468_v47 = vpop.permute.xlu0 %467 }
 0x11d   : > { %v768_v54 = vadd.f32 %v767_v53, %v433_v51  ;;  %v769_v55 = vpop.f32.mrb[23].mxu0  ;;  %1361 = vmatpush1.bf16.msra.mxu1 %v944_v45  ;;  %v892_v57 = vmax.f32 %v764_v49, 0.0 }
 0x11e   : > { %v770_v56 = vadd.f32 %v769_v55, %v433_v51  ;;  %v893_v59 = vmax.f32 %v766_v52, 0.0  ;;  %v473_v52 = vpop.permute.xlu1 %472 }
 0x11f   : > { %v894_v58 = vmax.f32 %v768_v54, 0.0 }
 0x120   : > { %v895_v60 = vmax.f32 %v770_v56, 0.0 }
 0x121   : > { %v946_v61 = vpack.c.bf16 %v894_v58, %v892_v57 }
 0x122   : > { %v947_v63 = vpack.c.bf16 %v895_v60, %v893_v59  ;;  %v773_v1 = vpop.f32.mrb[24].mxu0 }
 0x123   : > { %v774_v2 = vadd.f32 %v773_v1, %v438_v62  ;;  %v775_v3 = vpop.f32.mrb[25].mxu0 }
 0x124   : > { %v776_v5 = vadd.f32 %v775_v3, %v438_v62  ;;  %v777_v6 = vpop.f32.mrb[26].mxu0  ;;  %1362 = vmatprep.subr.bf16.mxu1 %v947_v63  ;;  %v478_v63 = vpop.permute.xlu0 %477 }
 0x125   : > { %v778_v7 = vadd.f32 %v777_v6, %v443_v4  ;;  %v779_v8 = vpop.f32.mrb[27].mxu0  ;;  %1363 = vmatpush1.bf16.msra.mxu1 %v946_v61  ;;  %v896_v10 = vmax.f32 %v774_v2, 0.0 }
 0x126   : > { %v780_v9 = vadd.f32 %v779_v8, %v443_v4  ;;  %v897_v12 = vmax.f32 %v776_v5, 0.0  ;;  %v483_v5 = vpop.permute.xlu1 %482 }
 0x127   : > { %v898_v11 = vmax.f32 %v778_v7, 0.0 }
 0x128   : > { %v899_v13 = vmax.f32 %v780_v9, 0.0 }
 0x129   : > { %v948_v14 = vpack.c.bf16 %v898_v11, %v896_v10 }
 0x12a   : > { %v949_v16 = vpack.c.bf16 %v899_v13, %v897_v12  ;;  %v783_v17 = vpop.f32.mrb[28].mxu0 }
 0x12b   : > { %v784_v18 = vadd.f32 %v783_v17, %v448_v15  ;;  %v785_v19 = vpop.f32.mrb[29].mxu0 }
 0x12c   : > { %v786_v21 = vadd.f32 %v785_v19, %v448_v15  ;;  %v787_v22 = vpop.f32.mrb[30].mxu0  ;;  %1364 = vmatprep.subr.bf16.mxu1 %v949_v16  ;;  %v488_v16 = vpop.permute.xlu0 %487 }
 0x12d   : > { %v788_v23 = vadd.f32 %v787_v22, %v453_v20  ;;  %v789_v24 = vpop.f32.mrb[31].mxu0  ;;  %1365 = vmatpush1.bf16.msra.mxu1 %v948_v14  ;;  %v900_v26 = vmax.f32 %v784_v18, 0.0 }
 0x12e   : > { %v790_v25 = vadd.f32 %v789_v24, %v453_v20  ;;  %v901_v28 = vmax.f32 %v786_v21, 0.0  ;;  %v493_v21 = vpop.permute.xlu1 %492 }
 0x12f   : > { %v902_v27 = vmax.f32 %v788_v23, 0.0 }
 0x130   : > { %v903_v29 = vmax.f32 %v790_v25, 0.0 }
 0x131   : > { %v950_v30 = vpack.c.bf16 %v902_v27, %v900_v26 }
 0x132   : > { %v951_v32 = vpack.c.bf16 %v903_v29, %v901_v28  ;;  %v793_v33 = vpop.f32.mrb[32].mxu0 }
 0x133   : > { %v794_v34 = vadd.f32 %v793_v33, %v458_v31  ;;  %v795_v35 = vpop.f32.mrb[33].mxu0 }
 0x134   : > { %v796_v37 = vadd.f32 %v795_v35, %v458_v31  ;;  %v797_v38 = vpop.f32.mrb[34].mxu0  ;;  %1366 = vmatprep.subr.bf16.mxu1 %v951_v32  ;;  %v498_v32 = vpop.permute.xlu0 %497 }
 0x135   : > { %v798_v39 = vadd.f32 %v797_v38, %v463_v36  ;;  %v799_v40 = vpop.f32.mrb[35].mxu0  ;;  %1367 = vmatpush1.bf16.msra.mxu1 %v950_v30  ;;  %v904_v42 = vmax.f32 %v794_v34, 0.0 }
 0x136   : > { %v800_v41 = vadd.f32 %v799_v40, %v463_v36  ;;  %v905_v44 = vmax.f32 %v796_v37, 0.0  ;;  %v503_v37 = vpop.permute.xlu1 %502 }
 0x137   : > { %v906_v43 = vmax.f32 %v798_v39, 0.0 }
 0x138   : > { %v907_v45 = vmax.f32 %v800_v41, 0.0 }
 0x139   : > { %v952_v46 = vpack.c.bf16 %v906_v43, %v904_v42 }
 0x13a   : > { %v953_v48 = vpack.c.bf16 %v907_v45, %v905_v44  ;;  %v803_v49 = vpop.f32.mrb[36].mxu0 }
 0x13b   : > { %v804_v50 = vadd.f32 %v803_v49, %v468_v47  ;;  %v805_v51 = vpop.f32.mrb[37].mxu0 }
 0x13c   : > { %v806_v53 = vadd.f32 %v805_v51, %v468_v47  ;;  %v807_v54 = vpop.f32.mrb[38].mxu0  ;;  %1368 = vmatprep.subr.bf16.mxu1 %v953_v48  ;;  %v508_v48 = vpop.permute.xlu0 %507 }
 0x13d   : > { %v808_v55 = vadd.f32 %v807_v54, %v473_v52  ;;  %v809_v56 = vpop.f32.mrb[39].mxu0  ;;  %1369 = vmatpush1.bf16.msra.mxu1 %v952_v46  ;;  %v908_v58 = vmax.f32 %v804_v50, 0.0 }
 0x13e   : > { %v810_v57 = vadd.f32 %v809_v56, %v473_v52  ;;  %v909_v60 = vmax.f32 %v806_v53, 0.0  ;;  %v513_v53 = vpop.permute.xlu1 %512 }
 0x13f   : > { %v910_v59 = vmax.f32 %v808_v55, 0.0 }
 0x140   : > { %v911_v61 = vmax.f32 %v810_v57, 0.0 }
 0x141   : > { %v954_v62 = vpack.c.bf16 %v910_v59, %v908_v58 }
 0x142   : > { %v955_v1 = vpack.c.bf16 %v911_v61, %v909_v60  ;;  %v813_v2 = vpop.f32.mrb[40].mxu0 }
 0x143   : > { %v814_v3 = vadd.f32 %v813_v2, %v478_v63  ;;  %v815_v4 = vpop.f32.mrb[41].mxu0 }
 0x144   : > { %v816_v6 = vadd.f32 %v815_v4, %v478_v63  ;;  %v817_v7 = vpop.f32.mrb[42].mxu0  ;;  %1370 = vmatprep.subr.bf16.mxu1 %v955_v1  ;;  %v518_v1 = vpop.permute.xlu0 %517 }
 0x145   : > { %v818_v8 = vadd.f32 %v817_v7, %v483_v5  ;;  %v819_v9 = vpop.f32.mrb[43].mxu0  ;;  %1371 = vmatpush1.bf16.msra.mxu1 %v954_v62  ;;  %v912_v11 = vmax.f32 %v814_v3, 0.0 }
 0x146   : > { %v820_v10 = vadd.f32 %v819_v9, %v483_v5  ;;  %v913_v13 = vmax.f32 %v816_v6, 0.0  ;;  %v523_v6 = vpop.permute.xlu1 %522 }
 0x147   : > { %v914_v12 = vmax.f32 %v818_v8, 0.0 }
 0x148   : > { %v915_v14 = vmax.f32 %v820_v10, 0.0 }
 0x149   : > { %v956_v15 = vpack.c.bf16 %v914_v12, %v912_v11 }
 0x14a   : > { %v957_v17 = vpack.c.bf16 %v915_v14, %v913_v13  ;;  %v823_v18 = vpop.f32.mrb[44].mxu0 }
 0x14b   : > { %v824_v19 = vadd.f32 %v823_v18, %v488_v16  ;;  %v825_v20 = vpop.f32.mrb[45].mxu0 }
 0x14c   : > { %v826_v22 = vadd.f32 %v825_v20, %v488_v16  ;;  %v827_v23 = vpop.f32.mrb[46].mxu0  ;;  %1372 = vmatprep.subr.bf16.mxu1 %v957_v17  ;;  %v528_v17 = vpop.permute.xlu0 %527 }
 0x14d   : > { %v828_v24 = vadd.f32 %v827_v23, %v493_v21  ;;  %v829_v25 = vpop.f32.mrb[47].mxu0  ;;  %1373 = vmatpush1.bf16.msra.mxu1 %v956_v15  ;;  %v916_v27 = vmax.f32 %v824_v19, 0.0 }
 0x14e   : > { %v830_v26 = vadd.f32 %v829_v25, %v493_v21  ;;  %v917_v29 = vmax.f32 %v826_v22, 0.0  ;;  %v533_v22 = vpop.permute.xlu1 %532 }
 0x14f   : > { %v918_v28 = vmax.f32 %v828_v24, 0.0 }
 0x150   : > { %v919_v30 = vmax.f32 %v830_v26, 0.0 }
 0x151   : > { %v958_v31 = vpack.c.bf16 %v918_v28, %v916_v27 }
 0x152   : > { %v959_v33 = vpack.c.bf16 %v919_v30, %v917_v29  ;;  %v833_v34 = vpop.f32.mrb[48].mxu0 }
 0x153   : > { %v834_v35 = vadd.f32 %v833_v34, %v498_v32  ;;  %v835_v36 = vpop.f32.mrb[49].mxu0  ;;  %v2102_v34 = vld [vmem:[%s2925_s3] ss:$8 sps:$4 sm:$0xff]  }
 0x154   : > { %v836_v38 = vadd.f32 %v835_v36, %v498_v32  ;;  %v837_v39 = vpop.f32.mrb[50].mxu0  ;;  %1374 = vmatprep.subr.bf16.mxu1 %v959_v33  ;;  %v2107_v36 = vld [vmem:[%s2925_s3 + $0x10] ss:$8 sps:$4 sm:$0xff]  }
 0x155   : > { %v838_v40 = vadd.f32 %v837_v39, %v503_v37  ;;  %v839_v41 = vpop.f32.mrb[51].mxu0  ;;  %1375 = vmatpush1.bf16.msra.mxu1 %v958_v31  ;;  %v920_v43 = vmax.f32 %v834_v35, 0.0  ;;  %v2105_v35 = vld [vmem:[%s2925_s3 + $0x14] ss:$8 sps:$4 sm:$0xff]  }
 0x156   : > { %v840_v42 = vadd.f32 %v839_v41, %v503_v37  ;;  %v921_v45 = vmax.f32 %v836_v38, 0.0  ;;  %v2108_v37 = vld [vmem:[%s2925_s3 + $0x24] ss:$8 sps:$4 sm:$0xff]   ;;  %v2110_v38 = vld [vmem:[%s2925_s3 + $0x20] ss:$8 sps:$4 sm:$0xff]  }
 0x157   : > { %v922_v44 = vmax.f32 %v838_v40, 0.0  ;;  %v2111_v39 = vld [vmem:[%s2925_s3 + $0x34] ss:$8 sps:$4 sm:$0xff]   ;;  %v2113_v40 = vld [vmem:[%s2925_s3 + $0x30] ss:$8 sps:$4 sm:$0xff]  }
 0x158   : > { %v923_v46 = vmax.f32 %v840_v42, 0.0  ;;  %v2114_v41 = vld [vmem:[%s2925_s3 + $0x44] ss:$8 sps:$4 sm:$0xff]   ;;  %v2116_v42 = vld [vmem:[%s2925_s3 + $0x40] ss:$8 sps:$4 sm:$0xff]  }
 0x159   : > { %v960_v47 = vpack.c.bf16 %v922_v44, %v920_v43  ;;  %v2117_v43 = vld [vmem:[%s2925_s3 + $0x54] ss:$8 sps:$4 sm:$0xff]   ;;  %v2119_v44 = vld [vmem:[%s2925_s3 + $0x50] ss:$8 sps:$4 sm:$0xff]  }
 0x15a   : > { %v961_v49 = vpack.c.bf16 %v923_v46, %v921_v45  ;;  %v843_v50 = vpop.f32.mrb[52].mxu0  ;;  %v2120_v45 = vld [vmem:[%s2925_s3 + $0x64] ss:$8 sps:$4 sm:$0xff]   ;;  %v2122_v46 = vld [vmem:[%s2925_s3 + $0x60] ss:$8 sps:$4 sm:$0xff]  }
 0x15b   : > { %v844_v51 = vadd.f32 %v843_v50, %v508_v48  ;;  %v845_v52 = vpop.f32.mrb[53].mxu0  ;;  %v2128_v50 = vld [vmem:[%s2925_s3 + $0x80] ss:$8 sps:$4 sm:$0xff]  }
 0x15c   : > { %v846_v54 = vadd.f32 %v845_v52, %v508_v48  ;;  %v847_v55 = vpop.f32.mrb[54].mxu0  ;;  %1376 = vmatprep.subr.bf16.mxu1 %v961_v49  ;;  %v2125_v48 = vld [vmem:[%s2925_s3 + $0x70] ss:$8 sps:$4 sm:$0xff]   ;;  %v2126_v49 = vld [vmem:[%s2925_s3 + $0x84] ss:$8 sps:$4 sm:$0xff]  }
 0x15d   : > { %v848_v56 = vadd.f32 %v847_v55, %v513_v53  ;;  %v849_v57 = vpop.f32.mrb[55].mxu0  ;;  %1377 = vmatpush1.bf16.msra.mxu1 %v960_v47  ;;  %v924_v59 = vmax.f32 %v844_v51, 0.0  ;;  %v2123_v47 = vld [vmem:[%s2925_s3 + $0x74] ss:$8 sps:$4 sm:$0xff]   ;;  %v2131_v52 = vld [vmem:[%s2925_s3 + $0x90] ss:$8 sps:$4 sm:$0xff]  }
 0x15e   : > { %v850_v58 = vadd.f32 %v849_v57, %v513_v53  ;;  %v925_v61 = vmax.f32 %v846_v54, 0.0  ;;  %v2129_v51 = vld [vmem:[%s2925_s3 + $0x94] ss:$8 sps:$4 sm:$0xff]   ;;  %v2132_v53 = vld [vmem:[%s2925_s3 + $0xa4] ss:$8 sps:$4 sm:$0xff]  }
 0x15f   : > { %v926_v60 = vmax.f32 %v848_v56, 0.0  ;;  %v2134_v54 = vld [vmem:[%s2925_s3 + $0xa0] ss:$8 sps:$4 sm:$0xff]   ;;  %v2135_v55 = vld [vmem:[%s2925_s3 + $0xb4] ss:$8 sps:$4 sm:$0xff]  }
 0x160   : > { %v927_v62 = vmax.f32 %v850_v58, 0.0  ;;  %v2137_v56 = vld [vmem:[%s2925_s3 + $0xb0] ss:$8 sps:$4 sm:$0xff]   ;;  %v2138_v57 = vld [vmem:[%s2925_s3 + $0xc4] ss:$8 sps:$4 sm:$0xff]  }
 0x161   : > { %v962_v63 = vpack.c.bf16 %v926_v60, %v924_v59  ;;  %v2140_v58 = vld [vmem:[%s2925_s3 + $0xc0] ss:$8 sps:$4 sm:$0xff]   ;;  %v2141_v59 = vld [vmem:[%s2925_s3 + $0xd4] ss:$8 sps:$4 sm:$0xff]   ;;  %v2143_v60 = vld [vmem:[%s2925_s3 + $0xd0] ss:$8 sps:$4 sm:$0xff]  }
 0x162   : > { %v963_v2 = vpack.c.bf16 %v927_v62, %v925_v61  ;;  %v853_v3 = vpop.f32.mrb[56].mxu0  ;;  %v2144_v61 = vld [vmem:[%s2925_s3 + $0xe4] ss:$8 sps:$4 sm:$0xff]   ;;  %v2146_v62 = vld [vmem:[%s2925_s3 + $0xe0] ss:$8 sps:$4 sm:$0xff]  }
 0x163   : > { %v854_v4 = vadd.f32 %v853_v3, %v518_v1  ;;  %v855_v5 = vpop.f32.mrb[57].mxu0 }
 0x164   : > { %v856_v7 = vadd.f32 %v855_v5, %v518_v1  ;;  %v857_v8 = vpop.f32.mrb[58].mxu0  ;;  %1378 = vmatprep.subr.bf16.mxu1 %v963_v2  ;;  %v2149_v1 = vld [vmem:[%s2925_s3 + $0xf0] ss:$8 sps:$4 sm:$0xff]   ;;  %v1035_v2 = vpop.permute.xlu0 %1034 }
 0x165   : > { %v858_v9 = vadd.f32 %v857_v8, %v523_v6  ;;  %v859_v10 = vpop.f32.mrb[59].mxu0  ;;  %1379 = vmatpush1.bf16.msra.mxu1 %v962_v63  ;;  %v928_v12 = vmax.f32 %v854_v4, 0.0  ;;  %v2147_v63 = vld [vmem:[%s2925_s3 + $0xf4] ss:$8 sps:$4 sm:$0xff]  }
 0x166   : > { %v860_v11 = vadd.f32 %v859_v10, %v523_v6  ;;  %v929_v14 = vmax.f32 %v856_v7, 0.0  ;;  %v1040_v6 = vpop.permute.xlu1 %1039 }
 0x167   : > { %v930_v13 = vmax.f32 %v858_v9, 0.0 }
 0x168   : > { %v931_v15 = vmax.f32 %v860_v11, 0.0 }
 0x169   : > { %v964_v16 = vpack.c.bf16 %v930_v13, %v928_v12 }
 0x16a   : > { %v965_v18 = vpack.c.bf16 %v931_v15, %v929_v14  ;;  %v863_v19 = vpop.f32.mrb[60].mxu0 }
 0x16b   : > { %v864_v20 = vadd.f32 %v863_v19, %v528_v17  ;;  %v865_v21 = vpop.f32.mrb[61].mxu0 }
 0x16c   : > { %v866_v23 = vadd.f32 %v865_v21, %v528_v17  ;;  %v867_v24 = vpop.f32.mrb[62].mxu0  ;;  %1380 = vmatprep.subr.bf16.mxu1 %v965_v18  ;;  %v1045_v17 = vpop.permute.xlu0 %1044 }
 0x16d   : > { %v868_v25 = vadd.f32 %v867_v24, %v533_v22  ;;  %v869_v26 = vpop.f32.mrb[63].mxu0  ;;  %1381 = vmatpush1.bf16.msra.mxu1 %v964_v16  ;;  %v932_v28 = vmax.f32 %v864_v20, 0.0 }
 0x16e   : > { %v870_v27 = vadd.f32 %v869_v26, %v533_v22  ;;  %v933_v30 = vmax.f32 %v866_v23, 0.0  ;;  %v1050_v22 = vpop.permute.xlu1 %1049 }
 0x16f   : > { %v934_v29 = vmax.f32 %v868_v25, 0.0 }
 0x170   : > { %v935_v31 = vmax.f32 %v870_v27, 0.0 }
 0x171   : > { %v966_v32 = vpack.c.bf16 %v934_v29, %v932_v28 }
 0x172   : > { %v967_v33 = vpack.c.bf16 %v935_v31, %v933_v30 }
 0x174   : > { %1382 = vmatprep.subr.bf16.mxu1 %v967_v33  ;;  %v1055_v33 = vpop.permute.xlu0 %1054 }
 0x175   : > { %1383 = vmatpush1.bf16.msra.mxu1 %v966_v32 }
 0x178   : > { %1385 = vmatmul.mubr.bf16.vlgmr.msra.gmra.mrb[0].mxu1 %v2102_v34 }
 0x179   : > { %1394 = vmatprep.mubr.bf16.mxu1 %v2105_v35 }
 0x180   : > { %1395 = vmatmul.mubr.bf16.gmra.mrb[4].mxu1 %v2107_v36 }
 0x181   : > { %1404 = vmatprep.mubr.bf16.mxu1 %v2108_v37 }
 0x188   : > { %1405 = vmatmul.mubr.bf16.gmra.mrb[8].mxu1 %v2110_v38  ;;  %v1060_v38 = vpop.permute.xlu1 %1059 }
 0x189   : > { %1414 = vmatprep.mubr.bf16.mxu1 %v2111_v39 }
 0x190   : > { %1415 = vmatmul.mubr.bf16.gmra.mrb[12].mxu1 %v2113_v40 }
 0x191   : > { %1424 = vmatprep.mubr.bf16.mxu1 %v2114_v41 }
 0x198   : > { %1425 = vmatmul.mubr.bf16.gmra.mrb[16].mxu1 %v2116_v42 }
 0x199   : > { %1434 = vmatprep.mubr.bf16.mxu1 %v2117_v43 }
 0x1a0   : > { %1435 = vmatmul.mubr.bf16.gmra.mrb[20].mxu1 %v2119_v44 }
 0x1a1   : > { %1444 = vmatprep.mubr.bf16.mxu1 %v2120_v45 }
 0x1a8   : > { %1445 = vmatmul.mubr.bf16.gmra.mrb[24].mxu1 %v2122_v46  ;;  %v1065_v46 = vpop.permute.xlu0 %1064 }
 0x1a9   : > { %1454 = vmatprep.mubr.bf16.mxu1 %v2123_v47 }
 0x1b0   : > { %1455 = vmatmul.mubr.bf16.gmra.mrb[28].mxu1 %v2125_v48 }
 0x1b1   : > { %1464 = vmatprep.mubr.bf16.mxu1 %v2126_v49 }
 0x1b8   : > { %1465 = vmatmul.mubr.bf16.gmra.mrb[32].mxu1 %v2128_v50  ;;  %v1070_v50 = vpop.permute.xlu1 %1069 }
 0x1b9   : > { %1474 = vmatprep.mubr.bf16.mxu1 %v2129_v51 }
 0x1c0   : > { %1475 = vmatmul.mubr.bf16.gmra.mrb[36].mxu1 %v2131_v52 }
 0x1c1   : > { %1484 = vmatprep.mubr.bf16.mxu1 %v2132_v53 }
 0x1c8   : > { %1485 = vmatmul.mubr.bf16.gmra.mrb[40].mxu1 %v2134_v54 }
 0x1c9   : > { %1494 = vmatprep.mubr.bf16.mxu1 %v2135_v55 }
 0x1d0   : > { %1495 = vmatmul.mubr.bf16.gmra.mrb[44].mxu1 %v2137_v56 }
 0x1d1   : > { %1504 = vmatprep.mubr.bf16.mxu1 %v2138_v57 }
 0x1d8   : > { %1505 = vmatmul.mubr.bf16.gmra.mrb[48].mxu1 %v2140_v58 }
 0x1d9   : > { %1514 = vmatprep.mubr.bf16.mxu1 %v2141_v59  ;;  %v1075_v59 = vpop.permute.xlu0 %1074 }
 0x1e0   : > { %1515 = vmatmul.mubr.bf16.gmra.mrb[52].mxu1 %v2143_v60 }
 0x1e1   : > { %1524 = vmatprep.mubr.bf16.mxu1 %v2144_v61 }
 0x1e8   : > { %1525 = vmatmul.mubr.bf16.gmra.mrb[56].mxu1 %v2146_v62 }
 0x1e9   : > { %1534 = vmatprep.mubr.bf16.mxu1 %v2147_v63  ;;  %v1080_v63 = vpop.permute.xlu1 %1079 }
 0x1f0   : > { %1535 = vmatmul.mubr.bf16.gmra.mrb[60].mxu1 %v2149_v1 }
 0x24b   : > { %v1386_v3 = vpop.f32.mrb[0].mxu1 }
 0x24c   : > { %v1387_v4 = vadd.f32 %v1386_v3, %v1035_v2  ;;  %v1388_v5 = vpop.f32.mrb[1].mxu1 }
 0x24d   : > { %v1389_v7 = vadd.f32 %v1388_v5, %v1035_v2  ;;  %v1390_v8 = vpop.f32.mrb[2].mxu1 }
 0x24e   : > { %v1391_v9 = vadd.f32 %v1390_v8, %v1040_v6  ;;  %v1392_v10 = vpop.f32.mrb[3].mxu1  ;;  %v1545_v12 = vmax.f32 %v1387_v4, 0.0 }
 0x24f   : > { %v1393_v11 = vadd.f32 %v1392_v10, %v1040_v6  ;;  %v1546_v14 = vmax.f32 %v1389_v7, 0.0  ;;  %v1115_v7 = vpop.permute.xlu0 %1114  ;;  %v1120_v10 = vpop.permute.xlu1 %1119 }
 0x250   : > { %v1547_v13 = vmax.f32 %v1391_v9, 0.0 }
 0x251   : > { %v1548_v15 = vmax.f32 %v1393_v11, 0.0 }
 0x252   : > { %v1641_v16 = vpack.c.bf16 %v1547_v13, %v1545_v12 }
 0x253   : > { %v1642_v18 = vpack.c.bf16 %v1548_v15, %v1546_v14  ;;  %v1396_v19 = vpop.f32.mrb[4].mxu1  ;;  %v2733_v11 = vpop.permute.xlu0 %1154 }
 0x254   : > { %v1397_v20 = vadd.f32 %v1396_v19, %v1045_v17  ;;  %v1398_v21 = vpop.f32.mrb[5].mxu1  ;;  %v2735_v14 = vpop.permute.xlu1 %1159 }
 0x255   : > { %v1399_v23 = vadd.f32 %v1398_v21, %v1045_v17  ;;  %v1400_v24 = vpop.f32.mrb[6].mxu1  ;;  %1737 = vmatprep.subr.bf16.mxu0 %v1642_v18 }
 0x256   : > { %v1401_v25 = vadd.f32 %v1400_v24, %v1050_v22  ;;  %v1402_v26 = vpop.f32.mrb[7].mxu1  ;;  %1738 = vmatpush1.bf16.msra.mxu0 %v1641_v16  ;;  %v1549_v28 = vmax.f32 %v1397_v20, 0.0 }
 0x257   : > { %v1403_v27 = vadd.f32 %v1402_v26, %v1050_v22  ;;  %v1550_v30 = vmax.f32 %v1399_v23, 0.0  ;;  %v1085_v17 = vpop.permute.xlu0 %1084 }
 0x258   : > { %v1551_v29 = vmax.f32 %v1401_v25, 0.0  ;;  %v1090_v18 = vpop.permute.xlu1 %1089 }
 0x259   : > { %v1552_v31 = vmax.f32 %v1403_v27, 0.0 }
 0x25a   : > { %v1643_v32 = vpack.c.bf16 %v1551_v29, %v1549_v28 }
 0x25b   : > { %v1644_v34 = vpack.c.bf16 %v1552_v31, %v1550_v30  ;;  %v1406_v35 = vpop.f32.mrb[8].mxu1  ;;  %v1125_v23 = vpop.permute.xlu0 %1124 }
 0x25c   : > { %v1407_v36 = vadd.f32 %v1406_v35, %v1055_v33  ;;  %v1408_v37 = vpop.f32.mrb[9].mxu1  ;;  %v1130_v24 = vpop.permute.xlu1 %1129 }
 0x25d   : > { %v1409_v39 = vadd.f32 %v1408_v37, %v1055_v33  ;;  %v1410_v40 = vpop.f32.mrb[10].mxu1  ;;  %1739 = vmatprep.subr.bf16.mxu0 %v1644_v34 }
 0x25e   : > { %v1411_v41 = vadd.f32 %v1410_v40, %v1060_v38  ;;  %v1412_v42 = vpop.f32.mrb[11].mxu1  ;;  %1740 = vmatpush1.bf16.msra.mxu0 %v1643_v32  ;;  %v1553_v44 = vmax.f32 %v1407_v36, 0.0 }
 0x25f   : > { %v1413_v43 = vadd.f32 %v1412_v42, %v1060_v38  ;;  %v1554_v47 = vmax.f32 %v1409_v39, 0.0  ;;  %v2749_v27 = vpop.permute.xlu0 %1164 }
 0x260   : > { %v1555_v45 = vmax.f32 %v1411_v41, 0.0  ;;  %v2755_v30 = vpop.permute.xlu1 %1169 }
 0x261   : > { %v1556_v48 = vmax.f32 %v1413_v43, 0.0 }
 0x262   : > { %v1645_v49 = vpack.c.bf16 %v1555_v45, %v1553_v44 }
 0x263   : > { %v1646_v51 = vpack.c.bf16 %v1556_v48, %v1554_v47  ;;  %v1416_v52 = vpop.f32.mrb[12].mxu1  ;;  %v1095_v32 = vpop.permute.xlu0 %1094 }
 0x264   : > { %v1417_v53 = vadd.f32 %v1416_v52, %v1065_v46  ;;  %v1418_v54 = vpop.f32.mrb[13].mxu1  ;;  %v1100_v38 = vpop.permute.xlu1 %1099 }
 0x265   : > { %v1419_v55 = vadd.f32 %v1418_v54, %v1065_v46  ;;  %v1420_v56 = vpop.f32.mrb[14].mxu1  ;;  %1741 = vmatprep.subr.bf16.mxu0 %v1646_v51 }
 0x266   : > { %v1421_v57 = vadd.f32 %v1420_v56, %v1070_v50  ;;  %v1422_v58 = vpop.f32.mrb[15].mxu1  ;;  %1742 = vmatpush1.bf16.msra.mxu0 %v1645_v49  ;;  %v1557_v61 = vmax.f32 %v1417_v53, 0.0 }
 0x267   : > { %v1423_v60 = vadd.f32 %v1422_v58, %v1070_v50  ;;  %v1558_v1 = vmax.f32 %v1419_v55, 0.0  ;;  %v1135_v52 = vpop.permute.xlu0 %1134 }
 0x268   : > { %v1559_v62 = vmax.f32 %v1421_v57, 0.0  ;;  %v1140_v58 = vpop.permute.xlu1 %1139 }
 0x269   : > { %v1560_v2 = vmax.f32 %v1423_v60, 0.0 }
 0x26a   : > { %v1647_v3 = vpack.c.bf16 %v1559_v62, %v1557_v61 }
 0x26b   : > { %v1648_v4 = vpack.c.bf16 %v1560_v2, %v1558_v1  ;;  %v1426_v5 = vpop.f32.mrb[16].mxu1 }
 0x26c   : > { %v1428_v6 = vpop.f32.mrb[17].mxu1  ;;  %v1427_v31 = vadd.f32 %v1426_v5, %v1075_v59 }
 0x26d   : > { %v1430_v8 = vpop.f32.mrb[18].mxu1  ;;  %1743 = vmatprep.subr.bf16.mxu0 %v1648_v4  ;;  %v1429_v33 = vadd.f32 %v1428_v6, %v1075_v59 }
 0x26e   : > { %v1432_v9 = vpop.f32.mrb[19].mxu1  ;;  %1744 = vmatpush1.bf16.msra.mxu0 %v1647_v3  ;;  %v1431_v35 = vadd.f32 %v1430_v8, %v1080_v63  ;;  %v1561_v42 = vmax.f32 %v1427_v31, 0.0 }
 0x26f   : > { %v1433_v39 = vadd.f32 %v1432_v9, %v1080_v63  ;;  %v1562_v46 = vmax.f32 %v1429_v33, 0.0  ;;  %v2765_v9 = vpop.permute.xlu0 %1174 }
 0x270   : > { %v1563_v49 = vmax.f32 %v1431_v35, 0.0 }
 0x271   : > { %v1564_v53 = vmax.f32 %v1433_v39, 0.0 }
 0x273   : > { %v1436_v12 = vpop.f32.mrb[20].mxu1 }
 0x274   : > { %v1438_v13 = vpop.f32.mrb[21].mxu1  ;;  %v1437_v56 = vadd.f32 %v1436_v12, %v1085_v17 }
 0x275   : > { %v1440_v15 = vpop.f32.mrb[22].mxu1  ;;  %v1439_v59 = vadd.f32 %v1438_v13, %v1085_v17 }
 0x276   : > { %v1442_v16 = vpop.f32.mrb[23].mxu1  ;;  %v1441_v62 = vadd.f32 %v1440_v15, %v1090_v18  ;;  %v1565_v5 = vmax.f32 %v1437_v56, 0.0 }
 0x277   : > { %v1443_v2 = vadd.f32 %v1442_v16, %v1090_v18 }
 0x278   : > { %v1567_v33 = vmax.f32 %v1441_v62, 0.0 }
 0x279   : > { %v1568_v15 = vmax.f32 %v1443_v2, 0.0 }
 0x27b   : > { %v2737_v19 = vpop.f32.mrb[24].mxu1 }
 0x27c   : > { %v2739_v20 = vpop.f32.mrb[25].mxu1  ;;  %v1447_v18 = vadd.f32 %v2737_v19, %v1095_v32 }
 0x27d   : > { %v2741_v21 = vpop.f32.mrb[26].mxu1 }
 0x27e   : > { %v2743_v22 = vpop.f32.mrb[27].mxu1 }
 0x283   : > { %v2745_v25 = vpop.f32.mrb[28].mxu1 }
 0x284   : > { %v2747_v26 = vpop.f32.mrb[29].mxu1 }
 0x285   : > { %v2751_v28 = vpop.f32.mrb[30].mxu1 }
 0x286   : > { %v2753_v29 = vpop.f32.mrb[31].mxu1 }
 0x28b   : > { %v1466_v34 = vpop.f32.mrb[32].mxu1 }
 0x28c   : > { %v1467_v36 = vadd.f32 %v1466_v34, %v1115_v7  ;;  %v1468_v37 = vpop.f32.mrb[33].mxu1  ;;  %v2769_v34 = vpop.permute.xlu1 %1179 }
 0x28d   : > { %v1469_v40 = vadd.f32 %v1468_v37, %v1115_v7  ;;  %v1470_v41 = vpop.f32.mrb[34].mxu1 }
 0x28e   : > { %v1577_v43 = vmax.f32 %v1467_v36, 0.0  ;;  %v1471_v44 = vadd.f32 %v1470_v41, %v1120_v10  ;;  %v1472_v45 = vpop.f32.mrb[35].mxu1  ;;  %v1449_v36 = vadd.f32 %v2739_v20, %v1095_v32 }
 0x28f   : > { %v1578_v47 = vmax.f32 %v1469_v40, 0.0  ;;  %v1473_v48 = vadd.f32 %v1472_v45, %v1120_v10  ;;  %v1566_v10 = vmax.f32 %v1439_v59, 0.0 }
 0x290   : > { %v2757_v50 = vadd.f32 %v1577_v43, %v1561_v42  ;;  %v1579_v51 = vmax.f32 %v1471_v44, 0.0  ;;  %v1105_v42 = vpop.permute.xlu0 %1104  ;;  %v1453_v43 = vadd.f32 %v2743_v22, %v1100_v38 }
 0x291   : > { %v2759_v54 = vadd.f32 %v1578_v47, %v1562_v46  ;;  %v1580_v55 = vmax.f32 %v1473_v48, 0.0  ;;  %v1569_v46 = vmax.f32 %v1447_v18, 0.0  ;;  %v1457_v22 = vadd.f32 %v2745_v25, %v1105_v42 }
 0x292   : > { %v2761_v57 = vadd.f32 %v1579_v51, %v1563_v49  ;;  %v1110_v49 = vpop.permute.xlu1 %1109  ;;  %v1570_v51 = vmax.f32 %v1449_v36, 0.0  ;;  %v1459_v62 = vadd.f32 %v2747_v26, %v1105_v42 }
 0x293   : > { %v2763_v60 = vadd.f32 %v1580_v55, %v1564_v53  ;;  %v1476_v61 = vpop.f32.mrb[36].mxu1 }
 0x294   : > { %v1477_v63 = vadd.f32 %v1476_v61, %v1125_v23  ;;  %v1478_v1 = vpop.f32.mrb[37].mxu1 }
 0x295   : > { %v1479_v3 = vadd.f32 %v1478_v1, %v1125_v23  ;;  %v1480_v4 = vpop.f32.mrb[38].mxu1 }
 0x296   : > { %v1581_v6 = vmax.f32 %v1477_v63, 0.0  ;;  %v1481_v7 = vadd.f32 %v1480_v4, %v1130_v24  ;;  %v1482_v8 = vpop.f32.mrb[39].mxu1  ;;  %v1150_v4 = vpop.permute.xlu1 %1149 }
 0x297   : > { %v1582_v12 = vmax.f32 %v1479_v3, 0.0  ;;  %v1483_v31 = vadd.f32 %v1482_v8, %v1130_v24  ;;  %v1451_v24 = vadd.f32 %v2741_v21, %v1100_v38  ;;  %v1572_v21 = vmax.f32 %v1453_v43, 0.0 }
 0x298   : > { %v2767_v13 = vadd.f32 %v1581_v6, %v1565_v5  ;;  %v1583_v17 = vmax.f32 %v1481_v7, 0.0  ;;  %v1463_v5 = vadd.f32 %v2753_v29, %v1110_v49  ;;  %v1573_v8 = vmax.f32 %v1457_v22, 0.0 }
 0x299   : > { %v2771_v35 = vadd.f32 %v1582_v12, %v1566_v10  ;;  %v1584_v16 = vmax.f32 %v1483_v31, 0.0  ;;  %v1571_v32 = vmax.f32 %v1451_v24, 0.0  ;;  %v1574_v31 = vmax.f32 %v1459_v62, 0.0 }
 0x29a   : > { %v2774_v23 = vadd.f32 %v1583_v17, %v1567_v33  ;;  %v1576_v18 = vmax.f32 %v1463_v5, 0.0 }
 0x29b   : > { %v2777_v37 = vadd.f32 %v1584_v16, %v1568_v15  ;;  %v1486_v39 = vpop.f32.mrb[40].mxu1 }
 0x29c   : > { %v1487_v40 = vadd.f32 %v1486_v39, %v1135_v52  ;;  %v1488_v41 = vpop.f32.mrb[41].mxu1 }
 0x29d   : > { %v1489_v44 = vadd.f32 %v1488_v41, %v1135_v52  ;;  %v1490_v45 = vpop.f32.mrb[42].mxu1  ;;  %v1145_v52 = vpop.permute.xlu0 %1144 }
 0x29e   : > { %v1585_v47 = vmax.f32 %v1487_v40, 0.0  ;;  %v1491_v48 = vadd.f32 %v1490_v45, %v1140_v58  ;;  %v1492_v19 = vpop.f32.mrb[43].mxu1 }
 0x29f   : > { %v1586_v53 = vmax.f32 %v1489_v44, 0.0  ;;  %v1493_v20 = vadd.f32 %v1492_v19, %v1140_v58  ;;  %v1461_v58 = vadd.f32 %v2751_v28, %v1110_v49 }
 0x2a0   : > { %v2781_v55 = vadd.f32 %v1585_v47, %v1569_v46  ;;  %v1587_v56 = vmax.f32 %v1491_v48, 0.0 }
 0x2a1   : > { %v2783_v59 = vadd.f32 %v1586_v53, %v1570_v51  ;;  %v1588_v61 = vmax.f32 %v1493_v20, 0.0  ;;  %v1575_v26 = vmax.f32 %v1461_v58, 0.0 }
 0x2a2   : > { %v2786_v38 = vadd.f32 %v1587_v56, %v1571_v32 }
 0x2a3   : > { %v2789_v63 = vadd.f32 %v1588_v61, %v1572_v21  ;;  %v1496_v1 = vpop.f32.mrb[44].mxu1 }
 0x2a4   : > { %v1497_v2 = vadd.f32 %v1496_v1, %v1145_v52  ;;  %v1498_v3 = vpop.f32.mrb[45].mxu1 }
 0x2a5   : > { %v1499_v6 = vadd.f32 %v1498_v3, %v1145_v52  ;;  %v1500_v7 = vpop.f32.mrb[46].mxu1 }
 0x2a6   : > { %v1589_v10 = vmax.f32 %v1497_v2, 0.0  ;;  %v1501_v25 = vadd.f32 %v1500_v7, %v1150_v4  ;;  %v1502_v12 = vpop.f32.mrb[47].mxu1 }
 0x2a7   : > { %v1590_v33 = vmax.f32 %v1499_v6, 0.0  ;;  %v1503_v17 = vadd.f32 %v1502_v12, %v1150_v4 }
 0x2a8   : > { %v2793_v15 = vadd.f32 %v1589_v10, %v1573_v8  ;;  %v1591_v16 = vmax.f32 %v1501_v25, 0.0 }
 0x2a9   : > { %v2795_v28 = vadd.f32 %v1590_v33, %v1574_v31  ;;  %v1592_v36 = vmax.f32 %v1503_v17, 0.0 }
 0x2aa   : > { %v2797_v39 = vadd.f32 %v1591_v16, %v1575_v26 }
 0x2ab   : > { %v2799_v29 = vadd.f32 %v1592_v36, %v1576_v18  ;;  %v1506_v24 = vpop.f32.mrb[48].mxu1 }
 0x2ac   : > { %v1507_v40 = vadd.f32 %v1506_v24, %v2733_v11  ;;  %v1508_v41 = vpop.f32.mrb[49].mxu1 }
 0x2ad   : > { %v1509_v42 = vadd.f32 %v1508_v41, %v2733_v11  ;;  %v1510_v43 = vpop.f32.mrb[50].mxu1 }
 0x2ae   : > { %v1593_v44 = vmax.f32 %v1507_v40, 0.0  ;;  %v1511_v45 = vadd.f32 %v1510_v43, %v2735_v14  ;;  %v1512_v46 = vpop.f32.mrb[51].mxu1 }
 0x2af   : > { %v1594_v47 = vmax.f32 %v1509_v42, 0.0  ;;  %v1513_v48 = vadd.f32 %v1512_v46, %v2735_v14  ;;  %v1190_v42 = vpop.permute.xlu1 %1189 }
 0x2b0   : > { %v1625_v19 = vadd.f32 %v2757_v50, %v1593_v44  ;;  %v1595_v49 = vmax.f32 %v1511_v45, 0.0 }
 0x2b1   : > { %v1626_v51 = vadd.f32 %v2759_v54, %v1594_v47  ;;  %v1596_v53 = vmax.f32 %v1513_v48, 0.0 }
 0x2b2   : > { %v1627_v20 = vadd.f32 %v2761_v57, %v1595_v49 }
 0x2b3   : > { %v1628_v32 = vadd.f32 %v2763_v60, %v1596_v53  ;;  %v1516_v56 = vpop.f32.mrb[52].mxu1 }
 0x2b4   : > { %v1649_v11 = vpack.c.bf16 %v1627_v20, %v1625_v19  ;;  %v1517_v21 = vadd.f32 %v1516_v56, %v2749_v27  ;;  %v1518_v61 = vpop.f32.mrb[53].mxu1 }
 0x2b5   : > { %v1519_v22 = vadd.f32 %v1518_v61, %v2749_v27  ;;  %v1520_v52 = vpop.f32.mrb[54].mxu1  ;;  %v1650_v62 = vpack.c.bf16 %v1628_v32, %v1626_v51  ;;  %v2150_v32 = vld [vmem:[%s2927_s5] sm:$0xff]   ;;  %v1681_v61 = vpop.permute.xlu1 %1680 }
 0x2b6   : > { %v1597_v14 = vmax.f32 %v1517_v21, 0.0  ;;  %v1521_v50 = vadd.f32 %v1520_v52, %v2755_v30  ;;  %v1522_v1 = vpop.f32.mrb[55].mxu1 }
 0x2b7   : > { %v1598_v58 = vmax.f32 %v1519_v22, 0.0  ;;  %v1523_v54 = vadd.f32 %v1522_v1, %v2755_v30  ;;  %1745 = vmatprep.subr.bf16.mxu0 %v1650_v62 }
 0x2b8   : > { %v1629_v57 = vadd.f32 %v2767_v13, %v1597_v14  ;;  %v1599_v60 = vmax.f32 %v1521_v50, 0.0  ;;  %1746 = vmatpush1.bf16.msra.mxu0 %v1649_v11 }
 0x2b9   : > { %v1630_v2 = vadd.f32 %v2771_v35, %v1598_v58  ;;  %v1600_v3 = vmax.f32 %v1523_v54, 0.0 }
 0x2ba   : > { %v1631_v4 = vadd.f32 %v2774_v23, %v1599_v60 }
 0x2bb   : > { %v1632_v27 = vadd.f32 %v2777_v37, %v1600_v3  ;;  %v1526_v5 = vpop.f32.mrb[56].mxu1 }
 0x2bc   : > { %v1651_v6 = vpack.c.bf16 %v1631_v4, %v1629_v57  ;;  %v1527_v7 = vadd.f32 %v1526_v5, %v2765_v9  ;;  %v1528_v8 = vpop.f32.mrb[57].mxu1  ;;  %v1691_v4 = vpop.permute.xlu1 %1690 }
 0x2bd   : > { %v1529_v10 = vadd.f32 %v1528_v8, %v2765_v9  ;;  %v1530_v30 = vpop.f32.mrb[58].mxu1  ;;  %v1652_v25 = vpack.c.bf16 %v1632_v27, %v1630_v2  ;;  %v1185_v9 = vpop.permute.xlu0 %1184 }
 0x2be   : > { %v1601_v12 = vmax.f32 %v1527_v7, 0.0  ;;  %v1531_v13 = vadd.f32 %v1530_v30, %v2769_v34  ;;  %v1532_v31 = vpop.f32.mrb[59].mxu1 }
 0x2bf   : > { %v1602_v33 = vmax.f32 %v1529_v10, 0.0  ;;  %v1533_v35 = vadd.f32 %v1532_v31, %v2769_v34  ;;  %1747 = vmatprep.subr.bf16.mxu0 %v1652_v25 }
 0x2c0   : > { %v1633_v23 = vadd.f32 %v2781_v55, %v1601_v12  ;;  %v1603_v37 = vmax.f32 %v1531_v13, 0.0  ;;  %1748 = vmatpush1.bf16.msra.mxu0 %v1651_v6 }
 0x2c1   : > { %v1634_v17 = vadd.f32 %v2783_v59, %v1602_v33  ;;  %v1604_v26 = vmax.f32 %v1533_v35, 0.0 }
 0x2c2   : > { %v1635_v16 = vadd.f32 %v2786_v38, %v1603_v37 }
 0x2c3   : > { %v1636_v18 = vadd.f32 %v2789_v63, %v1604_v26  ;;  %v1536_v36 = vpop.f32.mrb[60].mxu1 }
 0x2c4   : > { %v1653_v24 = vpack.c.bf16 %v1635_v16, %v1633_v23  ;;  %v1537_v40 = vadd.f32 %v1536_v36, %v1185_v9  ;;  %v1538_v41 = vpop.f32.mrb[61].mxu1  ;;  %v1701_v23 = vpop.permute.xlu1 %1700 }
 0x2c5   : > { %v1539_v43 = vadd.f32 %v1538_v41, %v1185_v9  ;;  %v1540_v34 = vpop.f32.mrb[62].mxu1  ;;  %v1654_v44 = vpack.c.bf16 %v1636_v18, %v1634_v17 }
 0x2c6   : > { %v1605_v45 = vmax.f32 %v1537_v40, 0.0  ;;  %v1541_v55 = vadd.f32 %v1540_v34, %v1190_v42  ;;  %v1542_v46 = vpop.f32.mrb[63].mxu1 }
 0x2c7   : > { %v1606_v47 = vmax.f32 %v1539_v43, 0.0  ;;  %v1543_v48 = vadd.f32 %v1542_v46, %v1190_v42  ;;  %1749 = vmatprep.subr.bf16.mxu0 %v1654_v44 }
 0x2c8   : > { %v1637_v59 = vadd.f32 %v2793_v15, %v1605_v45  ;;  %v1607_v38 = vmax.f32 %v1541_v55, 0.0  ;;  %1750 = vmatpush1.bf16.msra.mxu0 %v1653_v24  ;;  %v2151_v15 = vld [vmem:[%s2927_s5 + $0x8] sm:$0xff]   ;;  %v1711_v44 = vpop.permute.xlu1 %1710 }
 0x2c9   : > { %v1638_v63 = vadd.f32 %v2795_v28, %v1606_v47  ;;  %v1608_v19 = vmax.f32 %v1543_v48, 0.0  ;;  %v2152_v28 = vld [vmem:[%s2927_s5 + $0x10] sm:$0xff]  }
 0x2ca   : > { %v1639_v49 = vadd.f32 %v2797_v39, %v1607_v38  ;;  %v2153_v39 = vld [vmem:[%s2927_s5 + $0x18] sm:$0xff]  }
 0x2cb   : > { %v1640_v51 = vadd.f32 %v2799_v29, %v1608_v19  ;;  %v1676_v29 = vpop.permute.xlu0 %1675 }
 0x2cc   : > { %v1655_v53 = vpack.c.bf16 %v1639_v49, %v1637_v59 }
 0x2cd   : > { %v1656_v20 = vpack.c.bf16 %v1640_v51, %v1638_v63 }
 0x2cf   : > { %1751 = vmatprep.subr.bf16.mxu0 %v1656_v20  ;;  %v1686_v57 = vpop.permute.xlu0 %1685 }
 0x2d0   : > { %1752 = vmatpush1.bf16.msra.mxu0 %v1655_v53 }
 0x2d3   : > { %1770 = vmatmul.mubr.bf16.vlgmr.msra.gmra.mrb[64].mxu0 %v2150_v32  ;;  %v1696_v13 = vpop.permute.xlu0 %1695 }
 0x2d4   : > { %1779 = vmatprep.mubr.bf16.mxu0 %v2234_v0 }
 0x2d7   : > { %v1706_v41 = vpop.permute.xlu0 %1705 }
 0x2db   : > { %1780 = vmatmul.mubr.bf16.gmra.mrb[68].mxu0 %v2151_v15 }
 0x2dc   : > { %1789 = vmatprep.mubr.bf16.mxu0 %v2234_v0 }
 0x2e3   : > { %1790 = vmatmul.mubr.bf16.gmra.mrb[72].mxu0 %v2152_v28 }
 0x2e4   : > { %1799 = vmatprep.mubr.bf16.mxu0 %v2234_v0 }
 0x2eb   : > { %1800 = vmatmul.mubr.bf16.gmra.mrb[76].mxu0 %v2153_v39 }
 0x3a6   : > { %v1771_v56 = vpop.f32.mrb[64].mxu0 }
 0x3a7   : > { %v1772_v11 = vadd.f32 %v1771_v56, %v1676_v29  ;;  %v1773_v21 = vpop.f32.mrb[65].mxu0 }
 0x3a8   : > { %v1774_v22 = vadd.f32 %v1773_v21, %v1676_v29  ;;  %v1775_v52 = vpop.f32.mrb[66].mxu0 }
 0x3a9   : > { %v1810_v62 = vmax.f32 %v1772_v11, 0.0  ;;  %v1776_v14 = vadd.f32 %v1775_v52, %v1681_v61  ;;  %v1777_v50 = vpop.f32.mrb[67].mxu0 }
 0x3aa   : > { %v1811_v1 = vmax.f32 %v1774_v22, 0.0  ;;  %v1778_v0 = vadd.f32 %v1777_v50, %v1681_v61 }
 0x3ab   : > { %1826 = vst [vmem:[%s2847_s23] sm:$0xff] %v1810_v62  ;;  %v1812_v58 = vmax.f32 %v1776_v14, 0.0 }
 0x3ac   : > { %1827 = vst [vmem:[%s2847_s23 + $0x8] sm:$0xff] %v1811_v1  ;;  %v1813_v54 = vmax.f32 %v1778_v0, 0.0 }
 0x3ad   : > { %1828 = vst [vmem:[%s2847_s23 + $0x10] sm:$0xff] %v1812_v58 }
 0x3ae   : > { %1829 = vst [vmem:[%s2847_s23 + $0x18] sm:$0xff] %v1813_v54  ;;  %v1781_v60 = vpop.f32.mrb[68].mxu0 }
 0x3af   : > { %v1782_v2 = vadd.f32 %v1781_v60, %v1686_v57  ;;  %v1783_v3 = vpop.f32.mrb[69].mxu0 }
 0x3b0   : > { %v1784_v27 = vadd.f32 %v1783_v3, %v1686_v57  ;;  %v1785_v5 = vpop.f32.mrb[70].mxu0 }
 0x3b1   : > { %v1814_v6 = vmax.f32 %v1782_v2, 0.0  ;;  %v1786_v7 = vadd.f32 %v1785_v5, %v1691_v4  ;;  %v1787_v8 = vpop.f32.mrb[71].mxu0 }
 0x3b2   : > { %v1815_v10 = vmax.f32 %v1784_v27, 0.0  ;;  %v1788_v30 = vadd.f32 %v1787_v8, %v1691_v4 }
 0x3b3   : > { %1830 = vst [vmem:[%s2847_s23 + $0x20] sm:$0xff] %v1814_v6  ;;  %v1816_v25 = vmax.f32 %v1786_v7, 0.0 }
 0x3b4   : > { %1831 = vst [vmem:[%s2847_s23 + $0x28] sm:$0xff] %v1815_v10  ;;  %v1817_v12 = vmax.f32 %v1788_v30, 0.0 }
 0x3b5   : > { %1832 = vst [vmem:[%s2847_s23 + $0x30] sm:$0xff] %v1816_v25 }
 0x3b6   : > { %1833 = vst [vmem:[%s2847_s23 + $0x38] sm:$0xff] %v1817_v12  ;;  %v1791_v31 = vpop.f32.mrb[72].mxu0 }
 0x3b7   : > { %v1792_v33 = vadd.f32 %v1791_v31, %v1696_v13  ;;  %v1793_v35 = vpop.f32.mrb[73].mxu0 }
 0x3b8   : > { %v1794_v37 = vadd.f32 %v1793_v35, %v1696_v13  ;;  %v1795_v17 = vpop.f32.mrb[74].mxu0 }
 0x3b9   : > { %v1818_v26 = vmax.f32 %v1792_v33, 0.0  ;;  %v1796_v16 = vadd.f32 %v1795_v17, %v1701_v23  ;;  %v1797_v9 = vpop.f32.mrb[75].mxu0 }
 0x3ba   : > { %v1819_v18 = vmax.f32 %v1794_v37, 0.0  ;;  %v1798_v36 = vadd.f32 %v1797_v9, %v1701_v23 }
 0x3bb   : > { %1834 = vst [vmem:[%s2847_s23 + $0x40] sm:$0xff] %v1818_v26  ;;  %v1820_v24 = vmax.f32 %v1796_v16, 0.0 }
 0x3bc   : > { %1835 = vst [vmem:[%s2847_s23 + $0x48] sm:$0xff] %v1819_v18  ;;  %v1821_v40 = vmax.f32 %v1798_v36, 0.0 }
 0x3bd   : > { %1836 = vst [vmem:[%s2847_s23 + $0x50] sm:$0xff] %v1820_v24 }
 0x3be   : > { %1837 = vst [vmem:[%s2847_s23 + $0x58] sm:$0xff] %v1821_v40  ;;  %v1801_v42 = vpop.f32.mrb[76].mxu0 }
 0x3bf   : > { %v1802_v43 = vadd.f32 %v1801_v42, %v1706_v41  ;;  %v1803_v34 = vpop.f32.mrb[77].mxu0 }
 0x3c0   : > { %v1804_v45 = vadd.f32 %v1803_v34, %v1706_v41  ;;  %v1805_v55 = vpop.f32.mrb[78].mxu0 }
 0x3c1   : > { %v1822_v46 = vmax.f32 %v1802_v43, 0.0  ;;  %v1806_v47 = vadd.f32 %v1805_v55, %v1711_v44  ;;  %v1807_v48 = vpop.f32.mrb[79].mxu0 }
 0x3c2   : > { %v1823_v59 = vmax.f32 %v1804_v45, 0.0  ;;  %v1808_v38 = vadd.f32 %v1807_v48, %v1711_v44 }
 0x3c3   : > { %1838 = vst [vmem:[%s2847_s23 + $0x60] sm:$0xff] %v1822_v46  ;;  %v1824_v63 = vmax.f32 %v1806_v47, 0.0 }
 0x3c4   : > { %1839 = vst [vmem:[%s2847_s23 + $0x68] sm:$0xff] %v1823_v59  ;;  %v1825_v19 = vmax.f32 %v1808_v38, 0.0 }
 0x3c5   : > { %1840 = vst [vmem:[%s2847_s23 + $0x70] sm:$0xff] %v1824_v63 }
 0x3c6   : > { %1841 = vst [vmem:[%s2847_s23 + $0x78] sm:$0xff] %v1825_v19 }
 0x3c7   : > { %2167 = shalt.err (!%p2164_p5)
}
 0x3c8   : > { %s2168_s20 = scalar_lea.hbm %s2867_s15, 2048  ;;  %s2172_s23 = scalar_lea.hbm %s2929_s7, 4096 }
 0x3c9   : > { %p2169_p6 = scmp.ne.s32.totalorder %s2867_s15, %s2168_s20  ;;  %p2173_p10 = scmp.lt.u32.totalorder %s2867_s15, %s2929_s7 }
 0x3ca   : > { %p2174_p11 = scmp.lt.u32.totalorder %s2172_s23, %s2168_s20  ;;  %p2176_p13 = scmp.lt.u32.totalorder %s2168_s20, %s2867_s15 }
 0x3cb   : > { %p2170_p7 = pnand %p2169_p6, %p2318_p4 }
 0x3cc   : > { %p2175_p12 = por %p2174_p11, %p2173_p10 }
 0x3cd   : > { %p2171_p9 = pneg %p2170_p7 }
 0x3ce   : > { %p2177_p0 = por %p2176_p13, %p2175_p12 }
 0x3d0   : > { %p2178_p1 = pnand %p2177_p0, %p2171_p9 }
 0x3d2   : > { %2181 = shalt.err (!%p2178_p1)
}
 0x3d3   : > { %s2236_s12 = smov 256   ;;  %s2237_s16 = smov 16  }
 0x3d4   : > { %2023 = dma.vmem_to_hbm [thread:$0]  (%p2318_p4), %s2869_s8, 2048, %s2867_s15, %s2876_s27, %s2236_s12, %s2236_s12, %s2237_s16  }
 0x3d5 PF: > { %p2029_p2 = scmp.ge.s32.totalorder %s2232_s29, 2  ;;  %s1873_s17 = sand.u32 1, %s2212_s24  }
 0x3d6   : > { %s1874_s18 = scalar_lea.sflag [#allocation3], %s1873_s17 }
 0x3d7   : > { %p2026_p3 = pnand %p2029_p2, %p2325_p8 }
 0x3d9   : > { %2207 = dma.done.wait (!%p2026_p3), %s1874_s18, 2048  }
 0x3da   : > { %2209 = vsyncadd (!%p2026_p3), %s1874_s18, 4294965248  ;;  %s20_s29 = sadd.s32 1, %s2232_s29   ;;  %s2932_s24 = smov %s2216_s25 }
 0x3db   : > { %p17_p5 = scmp.ge.s32.totalorder %s20_s29, 4   ;;  %s2933_s25 = smov %s2220_s26 }
 0x3dc   : > { %s2934_s26 = smov %s2331_s14  ;;  %s2935_s27 = smov %s2228_s28 }
 0x3dd   : > { %s2936_s28 = smov %s2938_s9  ;;  %19 = sbr.rel (!%p17_p5) target bundleno = 4 (0x4), region = 83 }
 0x3e4   :  { %1879 = vsyncpa [#allocation3], 1 }
 0x3e5   :  { %1881 = vsyncpa [#allocation3 + $0x1], 1 }

</bundles_post_ra>
